<compile_context>
chip_gen: v6e
topology: v6e:2x2x1
jax: 0.10.0
libtpu: 0.0.40
codegen_flags: <defaults>
</compile_context>

<pallas_src>
import functools
import math

import jax
import jax.numpy as jnp
from jax.experimental import pallas as pl
from jax.experimental.pallas import tpu as pltpu

NEG_SLOPE = 0.01  # nn.LeakyReLU default negative slope


def _round_up(x, m):
    return ((x + m - 1) // m) * m


def _pad2(x, shape):
    return jnp.pad(x, [(0, t - s) for s, t in zip(x.shape, shape)])


def aggregator_gcn_kernel(adj_ref, x_src_ref, x_row_ref, in_deg_ref,
                          w_ref, b_ref, o_ref, acc_ref):
    k = pl.program_id(1)

    @pl.when(k == 0)
    def _init():
        acc_ref[...] = jnp.zeros_like(acc_ref)

    # Partial message passing: acc[i, :] += sum_k adj[i, k] * node[k, :]   (MXU, f32 acc)
    acc_ref[...] += jnp.dot(adj_ref[...], x_src_ref[...],
                            preferred_element_type=jnp.float32)

    @pl.when(k == pl.num_programs(1) - 1)
    def _finalize():
        n_h = acc_ref[...] * in_deg_ref[...]            # (tm, D) * (tm, 1)
        h = x_row_ref[...] + n_h                        # gcn: x + N_h   (f32 residual)
        z = jnp.dot(h, w_ref[...], preferred_element_type=jnp.float32) + b_ref[...]
        o_ref[...] = jnp.where(z >= 0, z, NEG_SLOPE * z).astype(o_ref.dtype)


@functools.partial(jax.jit, static_argnames=("tm", "tk", "matmul_dtype"))
def aggregator_gcn(adj, out_sqrt_deg, in_sqrt_deg, entity_embed, W, b,
                   *, tm=512, tk=1024, matmul_dtype=jnp.bfloat16):
    N, in_dim = entity_embed.shape
    out_dim = W.shape[1]

    # ---- Pick tiles first, then pad N so the preferred big tiles survive. ----
    N_128 = _round_up(N, 128)
    tm = min(_round_up(tm, 128), N_128)     # destination-node (row) tile
    tk = min(_round_up(tk, 128), N_128)     # source-node (reduction) tile
    N_pad = _round_up(N, math.lcm(tm, tk))
    D_pad = _round_up(in_dim, 128)
    O_pad = _round_up(out_dim, 128)         # lane-dense output -> unmasked vst

    f32 = jnp.float32
    # Fold out_sqrt_degree into the source-side embedding (fuses with the cast/pad copy).
    x_src = (entity_embed.astype(f32) * out_sqrt_deg.astype(f32)).astype(matmul_dtype)

    adj_p = _pad2(adj.astype(matmul_dtype), (N_pad, N_pad))
    xs_p = _pad2(x_src, (N_pad, D_pad))
    xr_p = _pad2(entity_embed.astype(f32), (N_pad, D_pad))
    id_p = _pad2(in_sqrt_deg.astype(f32), (N_pad, 1))
    W_p = _pad2(W.astype(f32), (D_pad, O_pad))
    b_p = _pad2(b.astype(f32), (1, O_pad))

    grid = (N_pad // tm, N_pad // tk)
    # TODO(synk): on v7x prefer an even row-tile count (grid[0]) so the "parallel" axis
    # shards evenly across both TensorCores; irrelevant for the tiny demo graph below.

    out_p = pl.pallas_call(
        aggregator_gcn_kernel,
        out_shape=jax.ShapeDtypeStruct((N_pad, O_pad), jnp.float32),
        grid_spec=pltpu.PrefetchScalarGridSpec(
            num_scalar_prefetch=0,
            grid=grid,
            in_specs=[
                pl.BlockSpec((tm, tk), lambda i, k: (i, k)),        # adjacency tile
                pl.BlockSpec((tk, D_pad), lambda i, k: (k, 0)),     # scaled src embed
                pl.BlockSpec((tm, D_pad), lambda i, k: (i, 0)),     # dst embed (residual)
                pl.BlockSpec((tm, 1), lambda i, k: (i, 0)),         # in_sqrt_degree (dst)
                pl.BlockSpec((D_pad, O_pad), lambda i, k: (0, 0),   # W: single-buffered,
                             pipeline_mode=pl.Buffered(buffer_count=1)),  # VMEM-resident
                pl.BlockSpec((1, O_pad), lambda i, k: (0, 0),       # b
                             pipeline_mode=pl.Buffered(buffer_count=1)),
            ],
            out_specs=pl.BlockSpec((tm, O_pad), lambda i, k: (i, 0)),
            scratch_shapes=[pltpu.VMEM((tm, D_pad), jnp.float32)],  # f32 accumulator
        ),
        compiler_params=pltpu.CompilerParams(
            dimension_semantics=("parallel", "arbitrary"),
            vmem_limit_bytes=48 * 1024 * 1024,
        ),
    )(adj_p, xs_p, xr_p, id_p, W_p, b_p)

    return out_p[:N, :out_dim]


def reference(adj, out_sqrt_deg, in_sqrt_deg, entity_embed, W, b):
    node = entity_embed * out_sqrt_deg
    n_h = (adj @ node) * in_sqrt_deg
    z = (entity_embed + n_h) @ W + b
    return jnp.where(z >= 0, z, NEG_SLOPE * z)


if __name__ == "__main__":
    key = jax.random.PRNGKey(0)
    # Small, non-aligned shapes to exercise padding/tiling in every dimension.
    N, in_dim, out_dim = 300, 48, 40

    k_adj, k_x, k_w, k_b = jax.random.split(key, 4)

    # Dense weighted adjacency (dense form of DGL u_mul_e + sum message passing):
    # adj[dst, src] = edge weight; sparsified random non-negative weights.
    adj = jax.random.uniform(k_adj, (N, N), dtype=jnp.float32)
    adj = jnp.where(adj > 0.6, adj, 0.0)

    # Symmetric-normalization degree scalers (as stored in g.ndata in the module).
    out_deg = jnp.maximum(adj.sum(axis=0), 1.0)   # out-degree of each source node
    in_deg = jnp.maximum(adj.sum(axis=1), 1.0)    # in-degree of each destination node
    out_sqrt_deg = (1.0 / jnp.sqrt(out_deg)).reshape(N, 1).astype(jnp.float32)
    in_sqrt_deg = (1.0 / jnp.sqrt(in_deg)).reshape(N, 1).astype(jnp.float32)

    entity_embed = jax.random.normal(k_x, (N, in_dim), dtype=jnp.float32)

    # Deterministic nn.Linear(in_dim, out_dim) init (uniform +/- 1/sqrt(in_dim)).
    bound = 1.0 / jnp.sqrt(jnp.float32(in_dim))
    W = jax.random.uniform(k_w, (in_dim, out_dim), minval=-bound, maxval=bound,
                           dtype=jnp.float32)
    b = jax.random.uniform(k_b, (1, out_dim), minval=-bound, maxval=bound,
                           dtype=jnp.float32)

    ref = reference(adj, out_sqrt_deg, in_sqrt_deg, entity_embed, W, b)

    # Exact-precision path (f32 adjacency stream) -> tight tolerance vs f32 reference.
    out_f32 = aggregator_gcn(adj, out_sqrt_deg, in_sqrt_deg, entity_embed, W, b,
                             matmul_dtype=jnp.float32)
    out_f32 = jax.block_until_ready(out_f32)
    assert out_f32.shape == (N, out_dim), out_f32.shape
    assert jnp.allclose(out_f32, ref, atol=1e-4, rtol=1e-4), \
        float(jnp.abs(out_f32 - ref).max())

    # Default bandwidth-optimized path (bf16 adjacency / source operand, f32 accumulate):
    # looser tolerance because the MXU products are bf16-rounded.
    out_bf16 = aggregator_gcn(adj, out_sqrt_deg, in_sqrt_deg, entity_embed, W, b)
    out_bf16 = jax.block_until_ready(out_bf16)
    assert out_bf16.shape == (N, out_dim), out_bf16.shape
    assert jnp.allclose(out_bf16, ref, atol=5e-2, rtol=5e-2), \
        float(jnp.abs(out_bf16 - ref).max())

    # TODO(synk): 'graphsage' / 'bi-interaction' aggregator variants and the use_noise
    # (torch.randn_like-based perturbation) path are not implemented; only the default
    # weighted-edge 'gcn' branch is covered.
    print("KERNEL_OK")
</pallas_src>

<mosaic_0001>
module attributes {stable_mosaic.version = 11 : i64} {
  func.func @aggregator_gcn_kernel(%arg0: i32, %arg1: i32, %arg2: memref<384x384xf32, #tpu.memory_space<vmem>>, %arg3: memref<384x128xf32, #tpu.memory_space<vmem>>, %arg4: memref<384x128xf32, #tpu.memory_space<vmem>>, %arg5: memref<384x1xf32, #tpu.memory_space<vmem>>, %arg6: memref<128x128xf32, #tpu.memory_space<vmem>>, %arg7: memref<1x128xf32, #tpu.memory_space<vmem>>, %arg8: memref<384x128xf32, #tpu.memory_space<vmem>>, %arg9: memref<384x128xf32, #tpu.memory_space<vmem>>) attributes {dimension_semantics = [#tpu.dimension_semantics<parallel>, #tpu.dimension_semantics<arbitrary>], iteration_bounds = array<i64: 1, 1>, scalar_prefetch = 0 : i64, scratch_operands = 1 : i64, tpu.core_type = #tpu.core_type<tc>, window_params = [{transform_indices = @transform_0, window_bounds = array<i64: 384, 384>}, {transform_indices = @transform_1, window_bounds = array<i64: 384, 128>}, {transform_indices = @transform_2, window_bounds = array<i64: 384, 128>}, {transform_indices = @transform_3, window_bounds = array<i64: 384, 1>}, {pipeline_mode = #tpu.pipeline_mode<synchronous>, transform_indices = @transform_4, window_bounds = array<i64: 128, 128>}, {pipeline_mode = #tpu.pipeline_mode<synchronous>, transform_indices = @transform_5, window_bounds = array<i64: 1, 128>}, {transform_indices = @transform_6, window_bounds = array<i64: 384, 128>}]} {
    %c0_i32 = arith.constant 0 : i32
    %0 = arith.cmpi eq, %arg1, %c0_i32 : i32
    %1 = arith.extui %0 : i1 to i32
    %c0_i32_0 = arith.constant 0 : i32
    %2 = arith.cmpi ne, %1, %c0_i32_0 : i32
    scf.if %2 {
      %cst_10 = arith.constant 0.000000e+00 : f32
      %12 = vector.broadcast %cst_10 : f32 to vector<384x128xf32>
      %c0_11 = arith.constant 0 : index
      %c0_12 = arith.constant 0 : index
      %13 = vector.load %arg9[%c0_11, %c0_12] : memref<384x128xf32, #tpu.memory_space<vmem>>, vector<384x128xf32>
      tpu.vector_store %arg9[%c0_11, %c0_12], %12 {strides = array<i32>} : memref<384x128xf32, #tpu.memory_space<vmem>>, vector<384x128xf32>,
    } else {
    }
    %c0 = arith.constant 0 : index
    %c0_1 = arith.constant 0 : index
    %3 = vector.load %arg9[%c0, %c0_1] : memref<384x128xf32, #tpu.memory_space<vmem>>, vector<384x128xf32>
    %c0_2 = arith.constant 0 : index
    %c0_3 = arith.constant 0 : index
    %4 = vector.load %arg2[%c0_2, %c0_3] : memref<384x384xf32, #tpu.memory_space<vmem>>, vector<384x384xf32>
    %c0_4 = arith.constant 0 : index
    %c0_5 = arith.constant 0 : index
    %5 = vector.load %arg3[%c0_4, %c0_5] : memref<384x128xf32, #tpu.memory_space<vmem>>, vector<384x128xf32>
    %cst = arith.constant dense<0.000000e+00> : vector<384x128xf32>
    %6 = tpu.matmul %4, %5, %cst {dimension_numbers = #tpu.dot_dimension_numbers<[1], [0], [0], [1], [0, 0, 1, 1], [], []>} : vector<384x384xf32>, vector<384x128xf32>, vector<384x128xf32> -> vector<384x128xf32>
    %7 = arith.addf %3, %6 : vector<384x128xf32>
    %c0_6 = arith.constant 0 : index
    %c0_7 = arith.constant 0 : index
    %8 = vector.load %arg9[%c0_6, %c0_7] : memref<384x128xf32, #tpu.memory_space<vmem>>, vector<384x128xf32>
    tpu.vector_store %arg9[%c0_6, %c0_7], %7 {strides = array<i32>} : memref<384x128xf32, #tpu.memory_space<vmem>>, vector<384x128xf32>,
    %c0_i32_8 = arith.constant 0 : i32
    %9 = arith.cmpi eq, %arg1, %c0_i32_8 : i32
    %10 = arith.extui %9 : i1 to i32
    %c0_i32_9 = arith.constant 0 : i32
    %11 = arith.cmpi ne, %10, %c0_i32_9 : i32
    scf.if %11 {
      %c0_10 = arith.constant 0 : index
      %c0_11 = arith.constant 0 : index
      %12 = vector.load %arg9[%c0_10, %c0_11] : memref<384x128xf32, #tpu.memory_space<vmem>>, vector<384x128xf32>
      %c0_12 = arith.constant 0 : index
      %c0_13 = arith.constant 0 : index
      %13 = vector.load %arg5[%c0_12, %c0_13] : memref<384x1xf32, #tpu.memory_space<vmem>>, vector<384x1xf32>
      %14 = vector.broadcast %13 : vector<384x1xf32> to vector<384x128xf32>
      %15 = arith.mulf %12, %14 : vector<384x128xf32>
      %c0_14 = arith.constant 0 : index
      %c0_15 = arith.constant 0 : index
      %16 = vector.load %arg4[%c0_14, %c0_15] : memref<384x128xf32, #tpu.memory_space<vmem>>, vector<384x128xf32>
      %17 = arith.addf %16, %15 : vector<384x128xf32>
      %c0_16 = arith.constant 0 : index
      %c0_17 = arith.constant 0 : index
      %18 = vector.load %arg6[%c0_16, %c0_17] : memref<128x128xf32, #tpu.memory_space<vmem>>, vector<128x128xf32>
      %cst_18 = arith.constant dense<0.000000e+00> : vector<384x128xf32>
      %19 = tpu.matmul %17, %18, %cst_18 {dimension_numbers = #tpu.dot_dimension_numbers<[1], [0], [0], [1], [0, 0, 1, 1], [], []>} : vector<384x128xf32>, vector<128x128xf32>, vector<384x128xf32> -> vector<384x128xf32>
      %c0_19 = arith.constant 0 : index
      %c0_20 = arith.constant 0 : index
      %20 = vector.load %arg7[%c0_19, %c0_20] : memref<1x128xf32, #tpu.memory_space<vmem>>, vector<1x128xf32>
      %21 = vector.broadcast %20 : vector<1x128xf32> to vector<384x128xf32>
      %22 = arith.addf %19, %21 : vector<384x128xf32>
      %cst_21 = arith.constant 0.000000e+00 : f32
      %23 = vector.broadcast %cst_21 : f32 to vector<384x128xf32>
      %24 = arith.cmpf oge, %22, %23 : vector<384x128xf32>
      %cst_22 = arith.constant 0.00999999977 : f32
      %25 = vector.broadcast %cst_22 : f32 to vector<384x128xf32>
      %26 = arith.mulf %25, %22 : vector<384x128xf32>
      %27 = arith.select %24, %22, %26 : vector<384x128xi1>, vector<384x128xf32>
      %c0_23 = arith.constant 0 : index
      %c0_24 = arith.constant 0 : index
      %28 = vector.load %arg8[%c0_23, %c0_24] : memref<384x128xf32, #tpu.memory_space<vmem>>, vector<384x128xf32>
      tpu.vector_store %arg8[%c0_23, %c0_24], %27 {strides = array<i32>} : memref<384x128xf32, #tpu.memory_space<vmem>>, vector<384x128xf32>,
    } else {
    }
    return
  }
  func.func @transform_0(%arg0: i32, %arg1: i32) -> (i32, i32) {
    %c0_i32 = arith.constant 0 : i32
    return %arg0, %arg1 : i32, i32
  }
  func.func @transform_1(%arg0: i32, %arg1: i32) -> (i32, i32) {
    %c0_i32 = arith.constant 0 : i32
    %c0_i32_0 = arith.constant 0 : i32
    return %arg1, %c0_i32 : i32, i32
  }
  func.func @transform_2(%arg0: i32, %arg1: i32) -> (i32, i32) {
    %c0_i32 = arith.constant 0 : i32
    %c0_i32_0 = arith.constant 0 : i32
    return %arg0, %c0_i32 : i32, i32
  }
  func.func @transform_3(%arg0: i32, %arg1: i32) -> (i32, i32) {
    %c0_i32 = arith.constant 0 : i32
    %c0_i32_0 = arith.constant 0 : i32
    return %arg0, %c0_i32 : i32, i32
  }
  func.func @transform_4(%arg0: i32, %arg1: i32) -> (i32, i32) {
    %c0_i32 = arith.constant 0 : i32
    %c0_i32_0 = arith.constant 0 : i32
    %c0_i32_1 = arith.constant 0 : i32
    return %c0_i32, %c0_i32_0 : i32, i32
  }
  func.func @transform_5(%arg0: i32, %arg1: i32) -> (i32, i32) {
    %c0_i32 = arith.constant 0 : i32
    %c0_i32_0 = arith.constant 0 : i32
    %c0_i32_1 = arith.constant 0 : i32
    return %c0_i32, %c0_i32_0 : i32, i32
  }
  func.func @transform_6(%arg0: i32, %arg1: i32) -> (i32, i32) {
    %c0_i32 = arith.constant 0 : i32
    %c0_i32_0 = arith.constant 0 : i32
    return %arg0, %c0_i32 : i32, i32
  }
}

</mosaic_0001>

<bundles_post_ra>
// kernel: aggregator_gcn.1
= control target key start
LH: loop header
LB: loop body
LE: loop exit
PB: predicated region body
PF: predicated region fallthrough
CT: control target
= control target key end

     0   :  { %v2369_v0 = vmov 0.0   ;;  %v2370_v7 = vmov 0   ;;  %s3549_s1 = inlined_call_operand.vmem [shape: f32[384,128], index: 1, kind: input, shape index: {}]   ;;  %s3550_s0 = inlined_call_operand.vmem [shape: f32[384,384], index: 0, kind: input, shape index: {}]   ;;  %s3551_s3 = inlined_call_operand.vmem [shape: f32[384,1], index: 3, kind: input, shape index: {}]   ;;  %s3552_s4 = inlined_call_operand.vmem [shape: f32[128,128], index: 4, kind: input, shape index: {}]   ;;  %s3553_s2 = inlined_call_operand.vmem [shape: f32[384,128], index: 2, kind: input, shape index: {}]   ;;  %s3554_s5 = inlined_call_operand.vmem [shape: f32[1,128], index: 5, kind: input, shape index: {}]   ;;  %s3555_s6 = inlined_call_operand.vmem [shape: f32[384,128], index: 6, kind: output, shape index: {}]  }
   0x1   :  { %315 = vmatprep.subr.mxu0 %v2369_v0  ;;  %v282_v1 = vld [vmem:[%s3549_s1 + $0x78] sm:$0xff]  ;;  %v281_v2 = vld [vmem:[%s3549_s1 + $0x70] sm:$0xff]  ;;  %v280_v3 = vld [vmem:[%s3549_s1 + $0x68] sm:$0xff]  ;;  %2367 = vset.pattern.permute.xlu0 %v2370_v7 }
   0x2   :  { %316 = vmatpush1.msra.mxu0 %v282_v1  ;;  %v279_v4 = vld [vmem:[%s3549_s1 + $0x60] sm:$0xff]  ;;  %v314_v5 = vld [vmem:[%s3549_s1 + $0x178] sm:$0xff]  ;;  %v313_v6 = vld [vmem:[%s3549_s1 + $0x170] sm:$0xff]  ;;  %2368 = vset.pattern.permute.xlu1 %v2370_v7 }
   0x3   :  { %317 = vmatprep.subr.mxu0 %v2369_v0  ;;  %v278_v8 = vld [vmem:[%s3549_s1 + $0x58] sm:$0xff]  ;;  %2157 = vmatprep.subr.mxu1 %v314_v5  ;;  %v312_v9 = vld [vmem:[%s3549_s1 + $0x168] sm:$0xff]  ;;  %v277_v10 = vld [vmem:[%s3549_s1 + $0x50] sm:$0xff] }
   0x4   :  { %318 = vmatpush1.msra.mxu0 %v281_v2  ;;  %2158 = vmatpush3.msra.mxu1 %v314_v5  ;;  %v311_v11 = vld [vmem:[%s3549_s1 + $0x160] sm:$0xff]  ;;  %v276_v12 = vld [vmem:[%s3549_s1 + $0x48] sm:$0xff]  ;;  %v310_v13 = vld [vmem:[%s3549_s1 + $0x158] sm:$0xff] }
   0x5   :  { %319 = vmatprep.subr.mxu0 %v2369_v0  ;;  %2159 = vmatprep.subr.mxu1 %v313_v6  ;;  %v275_v14 = vld [vmem:[%s3549_s1 + $0x40] sm:$0xff]  ;;  %v309_v15 = vld [vmem:[%s3549_s1 + $0x150] sm:$0xff]  ;;  %v274_v16 = vld [vmem:[%s3549_s1 + $0x38] sm:$0xff] }
   0x6   :  { %320 = vmatpush1.msra.mxu0 %v280_v3  ;;  %2160 = vmatpush3.msra.mxu1 %v313_v6  ;;  %v308_v17 = vld [vmem:[%s3549_s1 + $0x148] sm:$0xff]  ;;  %v273_v18 = vld [vmem:[%s3549_s1 + $0x30] sm:$0xff]  ;;  %v307_v19 = vld [vmem:[%s3549_s1 + $0x140] sm:$0xff] }
   0x7   :  { %321 = vmatprep.subr.mxu0 %v2369_v0  ;;  %2161 = vmatprep.subr.mxu1 %v312_v9  ;;  %v272_v20 = vld [vmem:[%s3549_s1 + $0x28] sm:$0xff]  ;;  %v306_v21 = vld [vmem:[%s3549_s1 + $0x138] sm:$0xff]  ;;  %v271_v22 = vld [vmem:[%s3549_s1 + $0x20] sm:$0xff] }
   0x8   :  { %322 = vmatpush1.msra.mxu0 %v279_v4  ;;  %2162 = vmatpush3.msra.mxu1 %v312_v9  ;;  %v305_v23 = vld [vmem:[%s3549_s1 + $0x130] sm:$0xff]  ;;  %v270_v24 = vld [vmem:[%s3549_s1 + $0x18] sm:$0xff]  ;;  %v304_v25 = vld [vmem:[%s3549_s1 + $0x128] sm:$0xff] }
   0x9   :  { %323 = vmatprep.subr.mxu0 %v2369_v0  ;;  %2163 = vmatprep.subr.mxu1 %v311_v11  ;;  %v269_v26 = vld [vmem:[%s3549_s1 + $0x10] sm:$0xff]  ;;  %v303_v27 = vld [vmem:[%s3549_s1 + $0x120] sm:$0xff]  ;;  %v268_v28 = vld [vmem:[%s3549_s1 + $0x8] sm:$0xff] }
   0xa   :  { %324 = vmatpush1.msra.mxu0 %v278_v8  ;;  %2164 = vmatpush3.msra.mxu1 %v311_v11  ;;  %v302_v29 = vld [vmem:[%s3549_s1 + $0x118] sm:$0xff]  ;;  %v267_v30 = vld [vmem:[%s3549_s1] sm:$0xff]  ;;  %v301_v31 = vld [vmem:[%s3549_s1 + $0x110] sm:$0xff] }
   0xb   :  { %325 = vmatprep.subr.mxu0 %v2369_v0  ;;  %2165 = vmatprep.subr.mxu1 %v310_v13  ;;  %v298_v32 = vld [vmem:[%s3549_s1 + $0xf8] sm:$0xff]  ;;  %v300_v33 = vld [vmem:[%s3549_s1 + $0x108] sm:$0xff]  ;;  %v297_v34 = vld [vmem:[%s3549_s1 + $0xf0] sm:$0xff] }
   0xc   :  { %326 = vmatpush1.msra.mxu0 %v277_v10  ;;  %2166 = vmatpush3.msra.mxu1 %v310_v13  ;;  %v299_v35 = vld [vmem:[%s3549_s1 + $0x100] sm:$0xff]  ;;  %v296_v36 = vld [vmem:[%s3549_s1 + $0xe8] sm:$0xff]  ;;  %v125_v37 = vld [vmem:[%s3550_s0 + $0x10] sm:$0xff] }
   0xd   :  { %327 = vmatprep.subr.mxu0 %v2369_v0  ;;  %2167 = vmatprep.subr.mxu1 %v309_v15  ;;  %v295_v38 = vld [vmem:[%s3549_s1 + $0xe0] sm:$0xff]  ;;  %v128_v39 = vld [vmem:[%s3550_s0 + $0x28] sm:$0xff]  ;;  %v294_v41 = vld [vmem:[%s3549_s1 + $0xd8] sm:$0xff] }
   0xe   :  { %328 = vmatpush1.msra.mxu0 %v276_v12  ;;  %2168 = vmatpush3.msra.mxu1 %v309_v15  ;;  %v124_v40 = vld [vmem:[%s3550_s0 + $0x8] sm:$0xff]  ;;  %v131_v42 = vld [vmem:[%s3550_s0 + $0x40] sm:$0xff]  ;;  %v293_v44 = vld [vmem:[%s3549_s1 + $0xd0] sm:$0xff] }
   0xf   :  { %329 = vmatprep.subr.mxu0 %v2369_v0  ;;  %2169 = vmatprep.subr.mxu1 %v308_v17  ;;  %v1072_v43 = vld [vmem:[%s3551_s3] sm:$0xff]  ;;  %v134_v45 = vld [vmem:[%s3550_s0 + $0x58] sm:$0xff]  ;;  %v137_v46 = vld [vmem:[%s3550_s0 + $0x70] sm:$0xff] }
  0x10   :  { %330 = vmatpush1.msra.mxu0 %v275_v14  ;;  %2170 = vmatpush3.msra.mxu1 %v308_v17  ;;  %v292_v47 = vld [vmem:[%s3549_s1 + $0xc8] sm:$0xff]  ;;  %v1074_v48 = vld [vmem:[%s3551_s3 + $0x10] sm:$0xff]  ;;  %v291_v49 = vld [vmem:[%s3549_s1 + $0xc0] sm:$0xff] }
  0x11   :  { %331 = vmatprep.subr.mxu0 %v2369_v0  ;;  %2171 = vmatprep.subr.mxu1 %v307_v19  ;;  %v140_v50 = vld [vmem:[%s3550_s0 + $0x88] sm:$0xff]  ;;  %v143_v51 = vld [vmem:[%s3550_s0 + $0xa0] sm:$0xff]  ;;  %v290_v52 = vld [vmem:[%s3549_s1 + $0xb8] sm:$0xff] }
  0x12   :  { %332 = vmatpush1.msra.mxu0 %v274_v16  ;;  %2172 = vmatpush3.msra.mxu1 %v307_v19  ;;  %v1073_v53 = vld [vmem:[%s3551_s3 + $0x8] sm:$0xff]  ;;  %v1075_v54 = vld [vmem:[%s3551_s3 + $0x18] sm:$0xff]  ;;  %v289_v55 = vld [vmem:[%s3549_s1 + $0xb0] sm:$0xff] }
  0x13   :  { %333 = vmatprep.subr.mxu0 %v2369_v0  ;;  %2173 = vmatprep.subr.mxu1 %v306_v21  ;;  %v146_v56 = vld [vmem:[%s3550_s0 + $0xb8] sm:$0xff]  ;;  %v149_v57 = vld [vmem:[%s3550_s0 + $0xd0] sm:$0xff]  ;;  %v288_v58 = vld [vmem:[%s3549_s1 + $0xa8] sm:$0xff] }
  0x14   :  { %334 = vmatpush1.msra.mxu0 %v273_v18  ;;  %2174 = vmatpush3.msra.mxu1 %v306_v21  ;;  %v1076_v59 = vld [vmem:[%s3551_s3 + $0x20] sm:$0xff]  ;;  %v1077_v60 = vld [vmem:[%s3551_s3 + $0x28] sm:$0xff]  ;;  %v286_v1 = vld [vmem:[%s3549_s1 + $0x98] sm:$0xff] }
  0x15   :  { %335 = vmatprep.subr.mxu0 %v2369_v0  ;;  %2175 = vmatprep.subr.mxu1 %v305_v23  ;;  %v287_v61 = vld [vmem:[%s3549_s1 + $0xa0] sm:$0xff]  ;;  %v152_v62 = vld [vmem:[%s3550_s0 + $0xe8] sm:$0xff]  ;;  %v1078_v2 = vld [vmem:[%s3551_s3 + $0x30] sm:$0xff] }
  0x16   :  { %336 = vmatpush1.msra.mxu0 %v272_v20  ;;  %2176 = vmatpush3.msra.mxu1 %v305_v23  ;;  %v155_v63 = vld [vmem:[%s3550_s0 + $0x100] sm:$0xff]  ;;  %v1079_v3 = vld [vmem:[%s3551_s3 + $0x38] sm:$0xff]  ;;  %v285_v4 = vld [vmem:[%s3549_s1 + $0x90] sm:$0xff] }
  0x17   :  { %337 = vmatprep.subr.mxu0 %v2369_v0  ;;  %2177 = vmatprep.subr.mxu1 %v304_v25  ;;  %v158_v5 = vld [vmem:[%s3550_s0 + $0x118] sm:$0xff]  ;;  %v161_v6 = vld [vmem:[%s3550_s0 + $0x130] sm:$0xff]  ;;  %v284_v7 = vld [vmem:[%s3549_s1 + $0x88] sm:$0xff] }
  0x18   :  { %338 = vmatpush1.msra.mxu0 %v271_v22  ;;  %2178 = vmatpush3.msra.mxu1 %v304_v25  ;;  %v1080_v8 = vld [vmem:[%s3551_s3 + $0x40] sm:$0xff]  ;;  %v1081_v9 = vld [vmem:[%s3551_s3 + $0x48] sm:$0xff]  ;;  %v1082_v15 = vld [vmem:[%s3551_s3 + $0x50] sm:$0xff] }
  0x19   :  { %339 = vmatprep.subr.mxu0 %v2369_v0  ;;  %2179 = vmatprep.subr.mxu1 %v303_v27  ;;  %v283_v10 = vld [vmem:[%s3549_s1 + $0x80] sm:$0xff]  ;;  %v164_v11 = vld [vmem:[%s3550_s0 + $0x148] sm:$0xff]  ;;  %v1083_v16 = vld [vmem:[%s3551_s3 + $0x58] sm:$0xff] }
  0x1a   :  { %340 = vmatpush1.msra.mxu0 %v270_v24  ;;  %2180 = vmatpush3.msra.mxu1 %v303_v27  ;;  %v123_v12 = vld [vmem:[%s3550_s0] sm:$0xff]  ;;  %v126_v17 = vld [vmem:[%s3550_s0 + $0x18] sm:$0xff]  ;;  %v173_v18 = vld [vmem:[%s3550_s0 + $0x190] sm:$0xff] }
  0x1b   :  { %341 = vmatprep.subr.mxu0 %v2369_v0  ;;  %2181 = vmatprep.subr.mxu1 %v302_v29  ;;  %v167_v13 = vld [vmem:[%s3550_s0 + $0x160] sm:$0xff]  ;;  %v130_v19 = vld [vmem:[%s3550_s0 + $0x38] sm:$0xff]  ;;  %v1085_v21 = vld [vmem:[%s3551_s3 + $0x68] sm:$0xff] }
  0x1c   :  { %342 = vmatpush1.msra.mxu0 %v269_v26  ;;  %2182 = vmatpush3.msra.mxu1 %v302_v29  ;;  %v127_v14 = vld [vmem:[%s3550_s0 + $0x20] sm:$0xff]  ;;  %v176_v22 = vld [vmem:[%s3550_s0 + $0x1a8] sm:$0xff]  ;;  %v129_v23 = vld [vmem:[%s3550_s0 + $0x30] sm:$0xff] }
  0x1d   :  { %343 = vmatprep.subr.mxu0 %v2369_v0  ;;  %2183 = vmatprep.subr.mxu1 %v301_v31  ;;  %v1084_v20 = vld [vmem:[%s3551_s3 + $0x60] sm:$0xff]  ;;  %v133_v25 = vld [vmem:[%s3550_s0 + $0x50] sm:$0xff]  ;;  %v1087_v27 = vld [vmem:[%s3551_s3 + $0x78] sm:$0xff] }
  0x1e   :  { %344 = vmatpush1.msra.mxu0 %v268_v28  ;;  %2184 = vmatpush3.msra.mxu1 %v301_v31  ;;  %v179_v24 = vld [vmem:[%s3550_s0 + $0x1c0] sm:$0xff]  ;;  %v1086_v26 = vld [vmem:[%s3551_s3 + $0x70] sm:$0xff]  ;;  %v182_v28 = vld [vmem:[%s3550_s0 + $0x1d8] sm:$0xff] }
  0x1f   :  { %345 = vmatprep.subr.mxu0 %v2369_v0  ;;  %2185 = vmatprep.subr.mxu1 %v300_v33  ;;  %v132_v29 = vld [vmem:[%s3550_s0 + $0x48] sm:$0xff] }
  0x20   :  { %346 = vmatpush1.msra.mxu0 %v267_v30  ;;  %2186 = vmatpush3.msra.mxu1 %v300_v33  ;;  %v185_v30 = vld [vmem:[%s3550_s0 + $0x1f0] sm:$0xff]  ;;  %v136_v31 = vld [vmem:[%s3550_s0 + $0x68] sm:$0xff] }
  0x21   :  { %347 = vmatprep.subr.mxu0 %v2369_v0  ;;  %2187 = vmatprep.subr.mxu1 %v299_v35  ;;  %v1089_v33 = vld [vmem:[%s3551_s3 + $0x88] sm:$0xff] }
  0x22   :  { %348 = vmatpush2.msra.mxu0 %v298_v32  ;;  %2188 = vmatpush3.msra.mxu1 %v299_v35  ;;  %v1088_v32 = vld [vmem:[%s3551_s3 + $0x80] sm:$0xff] }
  0x23   :  { %349 = vmatprep.subr.mxu0 %v2369_v0  ;;  %2189 = vmatprep.mubr.f32.mxu1 %v125_v37  ;;  %v135_v35 = vld [vmem:[%s3550_s0 + $0x60] sm:$0xff] }
  0x24   :  { %350 = vmatpush2.msra.mxu0 %v297_v34  ;;  %2190 = vmatmul.mubr.f32.vlgmr.msra.gmra.mxu1 %v128_v39  ;;  %v188_v34 = vld [vmem:[%s3550_s0 + $0x208] sm:$0xff]  ;;  %v139_v37 = vld [vmem:[%s3550_s0 + $0x80] sm:$0xff]  ;;  %v1091_v39 = vld [vmem:[%s3551_s3 + $0x98] sm:$0xff] }
  0x25   :  { %351 = vmatprep.subr.mxu0 %v2369_v0  ;;  %379 = vmatprep.mubr.f32.mxu0 %v124_v40  ;;  %v194_v40 = vld [vmem:[%s3550_s0 + $0x238] sm:$0xff] }
  0x26   :  { %352 = vmatpush2.msra.mxu0 %v296_v36  ;;  %2192 = vmatprep.mubr.f32.mxu1 %v131_v42  ;;  %v191_v36 = vld [vmem:[%s3550_s0 + $0x220] sm:$0xff]  ;;  %v197_v42 = vld [vmem:[%s3550_s0 + $0x250] sm:$0xff] }
  0x27   :  { %353 = vmatprep.subr.mxu0 %v2369_v0  ;;  %1122 = vperm.xlu0 %2367, %v1072_v43   ;;  %v142_v43 = vld [vmem:[%s3550_s0 + $0x98] sm:$0xff] }
  0x28   :  { %354 = vmatpush2.msra.mxu0 %v295_v38  ;;  %2193 = vmatmul.mubr.f32.gmra.mxu1 %v134_v45  ;;  %v1090_v38 = vld [vmem:[%s3551_s3 + $0x90] sm:$0xff]  ;;  %v1093_v45 = vld [vmem:[%s3551_s3 + $0xa8] sm:$0xff] }
  0x29   :  { %355 = vmatprep.subr.mxu0 %v2369_v0  ;;  %2195 = vmatprep.mubr.f32.mxu1 %v137_v46  ;;  %v200_v46 = vld [vmem:[%s3550_s0 + $0x268] sm:$0xff] }
  0x2a   :  { %356 = vmatpush2.msra.mxu0 %v294_v41  ;;  %1132 = vperm.xlu1 %2368, %v1074_v48   ;;  %v138_v41 = vld [vmem:[%s3550_s0 + $0x78] sm:$0xff]  ;;  %v203_v48 = vld [vmem:[%s3550_s0 + $0x280] sm:$0xff] }
  0x2b   :  { %357 = vmatprep.subr.mxu0 %v2369_v0  ;;  %1127 = vperm.xlu0 %2367, %v1073_v53   ;;  %v144_v53 = vld [vmem:[%s3550_s0 + $0xa8] sm:$0xff] }
  0x2c   :  { %358 = vmatpush2.msra.mxu0 %v293_v44  ;;  %2196 = vmatmul.mubr.f32.gmra.mxu1 %v140_v50  ;;  %v1092_v44 = vld [vmem:[%s3551_s3 + $0xa0] sm:$0xff]  ;;  %v1094_v50 = vld [vmem:[%s3551_s3 + $0xb0] sm:$0xff] }
  0x2d   :  { %359 = vmatprep.subr.mxu0 %v2369_v0  ;;  %2198 = vmatprep.mubr.f32.mxu1 %v143_v51  ;;  %v1095_v51 = vld [vmem:[%s3551_s3 + $0xb8] sm:$0xff] }
  0x2e   :  { %360 = vmatpush2.msra.mxu0 %v292_v47  ;;  %1137 = vperm.xlu1 %2368, %v1075_v54   ;;  %v141_v47 = vld [vmem:[%s3550_s0 + $0x90] sm:$0xff] }
  0x2f   :  { %361 = vmatprep.subr.mxu0 %v2369_v0  ;;  %1142 = vperm.xlu0 %2367, %v1076_v59   ;;  %v209_v54 = vld [vmem:[%s3550_s0 + $0x2b0] sm:$0xff]  ;;  %v147_v59 = vld [vmem:[%s3550_s0 + $0xc0] sm:$0xff] }
  0x30   :  { %362 = vmatpush2.msra.mxu0 %v291_v49  ;;  %2199 = vmatmul.mubr.f32.gmra.mxu1 %v146_v56  ;;  %v145_v49 = vld [vmem:[%s3550_s0 + $0xb0] sm:$0xff]  ;;  %v1096_v56 = vld [vmem:[%s3551_s3 + $0xc0] sm:$0xff] }
  0x31   :  { %363 = vmatprep.subr.mxu0 %v2369_v0  ;;  %2201 = vmatprep.mubr.f32.mxu1 %v149_v57  ;;  %v1097_v57 = vld [vmem:[%s3551_s3 + $0xc8] sm:$0xff] }
  0x32   :  { %364 = vmatpush2.msra.mxu0 %v290_v52  ;;  %1147 = vperm.xlu1 %2368, %v1077_v60   ;;  %v206_v52 = vld [vmem:[%s3550_s0 + $0x298] sm:$0xff]  ;;  %v215_v60 = vld [vmem:[%s3550_s0 + $0x2e0] sm:$0xff] }
  0x33   :  { %365 = vmatprep.subr.mxu0 %v2369_v0  ;;  %1152 = vperm.xlu0 %2367, %v1078_v2   ;;  %v150_v2 = vld [vmem:[%s3550_s0 + $0xd8] sm:$0xff] }
  0x34   :  { %366 = vmatpush2.msra.mxu0 %v289_v55  ;;  %2202 = vmatmul.mubr.f32.gmra.mxu1 %v152_v62  ;;  %v148_v55 = vld [vmem:[%s3550_s0 + $0xc8] sm:$0xff]  ;;  %v1098_v62 = vld [vmem:[%s3551_s3 + $0xd0] sm:$0xff] }
  0x35   :  { %367 = vmatprep.subr.mxu0 %v2369_v0  ;;  %2204 = vmatprep.mubr.f32.mxu1 %v155_v63  ;;  %v1099_v63 = vld [vmem:[%s3551_s3 + $0xd8] sm:$0xff] }
  0x36   :  { %368 = vmatpush2.msra.mxu0 %v288_v58  ;;  %1157 = vperm.xlu1 %2368, %v1079_v3   ;;  %v212_v58 = vld [vmem:[%s3550_s0 + $0x2c8] sm:$0xff]  ;;  %v221_v3 = vld [vmem:[%s3550_s0 + $0x310] sm:$0xff] }
  0x37   :  { %369 = vmatprep.subr.mxu0 %v2369_v0  ;;  %1162 = vperm.xlu0 %2367, %v1080_v8   ;;  %v153_v8 = vld [vmem:[%s3550_s0 + $0xf0] sm:$0xff] }
  0x38   :  { %370 = vmatpush2.msra.mxu0 %v287_v61  ;;  %2205 = vmatmul.mubr.f32.gmra.mxu1 %v158_v5  ;;  %v151_v61 = vld [vmem:[%s3550_s0 + $0xe0] sm:$0xff] }
  0x39   :  { %371 = vmatprep.subr.mxu0 %v2369_v0  ;;  %2207 = vmatprep.mubr.f32.mxu1 %v161_v6  ;;  %v1100_v5 = vld [vmem:[%s3551_s3 + $0xe0] sm:$0xff]  ;;  %v1101_v6 = vld [vmem:[%s3551_s3 + $0xe8] sm:$0xff] }
  0x3a   :  { %372 = vmatpush2.msra.mxu0 %v286_v1  ;;  %1167 = vperm.xlu1 %2368, %v1081_v9   ;;  %v218_v1 = vld [vmem:[%s3550_s0 + $0x2f8] sm:$0xff]  ;;  %v227_v9 = vld [vmem:[%s3550_s0 + $0x340] sm:$0xff] }
  0x3b   :  { %373 = vmatprep.subr.mxu0 %v2369_v0  ;;  %1172 = vperm.xlu0 %2367, %v1082_v15   ;;  %v233_v15 = vld [vmem:[%s3550_s0 + $0x370] sm:$0xff] }
  0x3c   :  { %374 = vmatpush2.msra.mxu0 %v285_v4  ;;  %2208 = vmatmul.mubr.f32.gmra.mxu1 %v164_v11  ;;  %v154_v4 = vld [vmem:[%s3550_s0 + $0xf8] sm:$0xff]  ;;  %v1102_v11 = vld [vmem:[%s3551_s3 + $0xf0] sm:$0xff] }
  0x3d   :  { %375 = vmatprep.subr.mxu0 %v2369_v0  ;;  %2210 = vmatprep.mubr.f32.mxu1 %v167_v13  ;;  %v230_v13 = vld [vmem:[%s3550_s0 + $0x358] sm:$0xff] }
  0x3e   :  { %376 = vmatpush2.msra.mxu0 %v284_v7  ;;  %1177 = vperm.xlu1 %2368, %v1083_v16   ;;  %v224_v7 = vld [vmem:[%s3550_s0 + $0x328] sm:$0xff] }
  0x3f   :  { %377 = vmatprep.subr.mxu0 %v2369_v0  ;;  %v170_v0 = vld [vmem:[%s3550_s0 + $0x178] sm:$0xff]  ;;  %1182 = vperm.xlu0 %2367, %v1084_v20   ;;  %v160_v16 = vld [vmem:[%s3550_s0 + $0x128] sm:$0xff]  ;;  %v1518_v20 = vld [vmem:[%s3552_s4 + $0x70] sm:$0xff] }
  0x40   :  { %378 = vmatpush2.msra.mxu0 %v283_v10  ;;  %2211 = vmatmul.mubr.f32.gmra.mxu1 %v170_v0  ;;  %v157_v10 = vld [vmem:[%s3550_s0 + $0x110] sm:$0xff]  ;;  %v1104_v0 = vld [vmem:[%s3551_s3 + $0x100] sm:$0xff] }
  0x41   :  { %380 = vmatmul.mubr.f32.vlgmr.msra.gmra.mxu0 %v123_v12  ;;  %2213 = vmatprep.mubr.f32.mxu1 %v173_v18  ;;  %v1103_v12 = vld [vmem:[%s3551_s3 + $0xf8] sm:$0xff]  ;;  %v1105_v18 = vld [vmem:[%s3551_s3 + $0x108] sm:$0xff] }
  0x42   :  { %384 = vmatprep.mubr.f32.mxu0 %v127_v14  ;;  %1187 = vperm.xlu1 %2368, %v1085_v21   ;;  %v156_v14 = vld [vmem:[%s3550_s0 + $0x108] sm:$0xff]  ;;  %v159_v21 = vld [vmem:[%s3550_s0 + $0x120] sm:$0xff] }
  0x43   :  { %1192 = vperm.xlu0 %2367, %v1086_v26   ;;  %v242_v26 = vld [vmem:[%s3550_s0 + $0x3b8] sm:$0xff] }
  0x44   :  { %2214 = vmatmul.mubr.f32.gmra.mxu1 %v176_v22  ;;  %v239_v22 = vld [vmem:[%s3550_s0 + $0x3a0] sm:$0xff] }
  0x45   :  { %385 = vmatmul.mubr.f32.gmra.mxu0 %v126_v17  ;;  %2216 = vmatprep.mubr.f32.mxu1 %v179_v24  ;;  %v1519_v17 = vld [vmem:[%s3552_s4 + $0x78] sm:$0xff]  ;;  %v1106_v24 = vld [vmem:[%s3551_s3 + $0x110] sm:$0xff] }
  0x46   :  { %389 = vmatprep.mubr.f32.mxu0 %v130_v19  ;;  %1197 = vperm.xlu1 %2368, %v1087_v27   ;;  %v236_v19 = vld [vmem:[%s3550_s0 + $0x388] sm:$0xff] }
  0x47   :  { %1202 = vperm.xlu0 %2367, %v1088_v32   ;;  %2261 = vmatprep.subr.mxu1 %v1519_v17  ;;  %v1517_v27 = vld [vmem:[%s3552_s4 + $0x68] sm:$0xff] }
  0x48   :  { %2217 = vmatmul.mubr.f32.gmra.mxu1 %v182_v28  ;;  %v162_v28 = vld [vmem:[%s3550_s0 + $0x138] sm:$0xff]  ;;  %v1109_v32 = vld [vmem:[%s3551_s3 + $0x128] sm:$0xff] }
  0x49   :  { %390 = vmatmul.mubr.f32.gmra.mxu0 %v129_v23  ;;  %2219 = vmatprep.mubr.f32.mxu1 %v185_v30  ;;  %v163_v23 = vld [vmem:[%s3550_s0 + $0x140] sm:$0xff]  ;;  %v166_v30 = vld [vmem:[%s3550_s0 + $0x158] sm:$0xff] }
  0x4a   :  { %394 = vmatprep.mubr.f32.mxu0 %v133_v25  ;;  %1207 = vperm.xlu1 %2368, %v1089_v33   ;;  %v1107_v25 = vld [vmem:[%s3551_s3 + $0x118] sm:$0xff]  ;;  %v248_v33 = vld [vmem:[%s3550_s0 + $0x3e8] sm:$0xff] }
  0x4b   :  { %1212 = vperm.xlu0 %2367, %v1090_v38   ;;  %2262 = vmatpush3.msra.mxu1 %v1519_v17  ;;  %v1110_v38 = vld [vmem:[%s3551_s3 + $0x130] sm:$0xff]  ;;  %v192_v17 = vld [vmem:[%s3550_s0 + $0x228] sm:$0xff] }
  0x4c   :  { %2220 = vmatmul.mubr.f32.gmra.mxu1 %v188_v34  ;;  %2263 = vmatprep.subr.mxu1 %v1518_v20  ;;  %v1516_v34 = vld [vmem:[%s3552_s4 + $0x60] sm:$0xff] }
  0x4d   :  { %395 = vmatmul.mubr.f32.gmra.mxu0 %v132_v29  ;;  %2222 = vmatprep.mubr.f32.mxu1 %v191_v36  ;;  %v245_v29 = vld [vmem:[%s3550_s0 + $0x3d0] sm:$0xff]  ;;  %v251_v36 = vld [vmem:[%s3550_s0 + $0x400] sm:$0xff] }
  0x4e   :  { %399 = vmatprep.mubr.f32.mxu0 %v136_v31  ;;  %1217 = vperm.xlu1 %2368, %v1091_v39   ;;  %v1108_v31 = vld [vmem:[%s3551_s3 + $0x120] sm:$0xff]  ;;  %v1111_v39 = vld [vmem:[%s3551_s3 + $0x138] sm:$0xff] }
  0x4f   :  { %1222 = vperm.xlu0 %2367, %v1092_v44   ;;  %2264 = vmatpush3.msra.mxu1 %v1518_v20  ;;  %v172_v44 = vld [vmem:[%s3550_s0 + $0x188] sm:$0xff]  ;;  %v199_v20 = vld [vmem:[%s3550_s0 + $0x260] sm:$0xff] }
  0x50   :  { %2223 = vmatmul.mubr.f32.gmra.mxu1 %v194_v40  ;;  %2265 = vmatprep.subr.mxu1 %v1517_v27  ;;  %v254_v40 = vld [vmem:[%s3550_s0 + $0x418] sm:$0xff] }
  0x51   :  { %400 = vmatmul.mubr.f32.gmra.mxu0 %v135_v35  ;;  %2225 = vmatprep.mubr.f32.mxu1 %v197_v42  ;;  %v165_v35 = vld [vmem:[%s3550_s0 + $0x150] sm:$0xff]  ;;  %v168_v42 = vld [vmem:[%s3550_s0 + $0x168] sm:$0xff] }
  0x52   :  { %404 = vmatprep.mubr.f32.mxu0 %v139_v37  ;;  %1227 = vperm.xlu1 %2368, %v1093_v45   ;;  %v169_v37 = vld [vmem:[%s3550_s0 + $0x170] sm:$0xff]  ;;  %v1112_v45 = vld [vmem:[%s3551_s3 + $0x140] sm:$0xff] }
  0x53   :  { %1232 = vperm.xlu0 %2367, %v1094_v50   ;;  %2266 = vmatpush3.msra.mxu1 %v1517_v27  ;;  %v263_v50 = vld [vmem:[%s3550_s0 + $0x460] sm:$0xff] }
  0x54   :  { %2226 = vmatmul.mubr.f32.gmra.mxu1 %v200_v46  ;;  %2267 = vmatprep.subr.mxu1 %v1516_v34  ;;  %v1113_v46 = vld [vmem:[%s3551_s3 + $0x148] sm:$0xff]  ;;  %v207_v27 = vld [vmem:[%s3550_s0 + $0x2a0] sm:$0xff] }
  0x55   :  { %405 = vmatmul.mubr.f32.gmra.mxu0 %v138_v41  ;;  %2228 = vmatprep.mubr.f32.mxu1 %v203_v48  ;;  %v1515_v41 = vld [vmem:[%s3552_s4 + $0x58] sm:$0xff]  ;;  %v1514_v48 = vld [vmem:[%s3552_s4 + $0x50] sm:$0xff] }
  0x56   :  { %409 = vmatprep.mubr.f32.mxu0 %v142_v43  ;;  %1237 = vperm.xlu1 %2368, %v1095_v51   ;;  %v257_v43 = vld [vmem:[%s3550_s0 + $0x430] sm:$0xff]  ;;  %v175_v51 = vld [vmem:[%s3550_s0 + $0x1a0] sm:$0xff] }
  0x57   :  { %1242 = vperm.xlu0 %2367, %v1096_v56   ;;  %2268 = vmatpush3.msra.mxu1 %v1516_v34  ;;  %v174_v56 = vld [vmem:[%s3550_s0 + $0x198] sm:$0xff]  ;;  %v220_v34 = vld [vmem:[%s3550_s0 + $0x308] sm:$0xff] }
  0x58   :  { %2229 = vmatmul.mubr.f32.gmra.mxu1 %v206_v52  ;;  %2269 = vmatprep.subr.mxu1 %v1515_v41  ;;  %v1114_v52 = vld [vmem:[%s3551_s3 + $0x150] sm:$0xff] }
  0x59   :  { %410 = vmatmul.mubr.f32.gmra.mxu0 %v141_v47  ;;  %2231 = vmatprep.mubr.f32.mxu1 %v209_v54  ;;  %v260_v47 = vld [vmem:[%s3550_s0 + $0x448] sm:$0xff]  ;;  %v266_v54 = vld [vmem:[%s3550_s0 + $0x478] sm:$0xff] }
  0x5a   :  { %414 = vmatprep.mubr.f32.mxu0 %v145_v49  ;;  %1247 = vperm.xlu1 %2368, %v1097_v57   ;;  %v171_v49 = vld [vmem:[%s3550_s0 + $0x180] sm:$0xff]  ;;  %v178_v57 = vld [vmem:[%s3550_s0 + $0x1b8] sm:$0xff] }
  0x5b   :  { %1252 = vperm.xlu0 %2367, %v1098_v62   ;;  %2270 = vmatpush3.msra.mxu1 %v1515_v41  ;;  %v1511_v62 = vld [vmem:[%s3552_s4 + $0x38] sm:$0xff]  ;;  %v228_v41 = vld [vmem:[%s3550_s0 + $0x348] sm:$0xff] }
  0x5c   :  { %2232 = vmatmul.mubr.f32.gmra.mxu1 %v212_v58  ;;  %2271 = vmatprep.subr.mxu1 %v1514_v48  ;;  %v1116_v58 = vld [vmem:[%s3551_s3 + $0x160] sm:$0xff] }
  0x5d   :  { %415 = vmatmul.mubr.f32.gmra.mxu0 %v144_v53  ;;  %2234 = vmatprep.mubr.f32.mxu1 %v215_v60  ;;  %v1115_v53 = vld [vmem:[%s3551_s3 + $0x158] sm:$0xff]  ;;  %v1512_v60 = vld [vmem:[%s3552_s4 + $0x40] sm:$0xff] }
  0x5e   :  { %419 = vmatprep.mubr.f32.mxu0 %v148_v55  ;;  %1257 = vperm.xlu1 %2368, %v1099_v63   ;;  %v1513_v55 = vld [vmem:[%s3552_s4 + $0x48] sm:$0xff]  ;;  %v181_v63 = vld [vmem:[%s3550_s0 + $0x1d0] sm:$0xff] }
  0x5f   :  { %1262 = vperm.xlu0 %2367, %v1100_v5   ;;  %2272 = vmatpush3.msra.mxu1 %v1514_v48  ;;  %v184_v5 = vld [vmem:[%s3550_s0 + $0x1e8] sm:$0xff]  ;;  %v241_v48 = vld [vmem:[%s3550_s0 + $0x3b0] sm:$0xff] }
  0x60   :  { %2235 = vmatmul.mubr.f32.gmra.mxu1 %v218_v1  ;;  %2273 = vmatprep.subr.mxu1 %v1513_v55  ;;  %v1118_v1 = vld [vmem:[%s3551_s3 + $0x170] sm:$0xff] }
  0x61   :  { %420 = vmatmul.mubr.f32.gmra.mxu0 %v147_v59  ;;  %2237 = vmatprep.mubr.f32.mxu1 %v221_v3  ;;  %v1117_v59 = vld [vmem:[%s3551_s3 + $0x168] sm:$0xff]  ;;  %v1510_v3 = vld [vmem:[%s3552_s4 + $0x30] sm:$0xff] }
  0x62   :  { %424 = vmatprep.mubr.f32.mxu0 %v151_v61  ;;  %1267 = vperm.xlu1 %2368, %v1101_v6   ;;  %v177_v61 = vld [vmem:[%s3550_s0 + $0x1b0] sm:$0xff]  ;;  %v1509_v6 = vld [vmem:[%s3552_s4 + $0x28] sm:$0xff] }
  0x63   :  { %1272 = vperm.xlu0 %2367, %v1102_v11   ;;  %2274 = vmatpush3.msra.mxu1 %v1513_v55  ;;  %v1506_v11 = vld [vmem:[%s3552_s4 + $0x10] sm:$0xff] }
  0x64   :  { %2238 = vmatmul.mubr.f32.gmra.mxu1 %v224_v7  ;;  %2275 = vmatprep.subr.mxu1 %v1512_v60  ;;  %v1508_v7 = vld [vmem:[%s3552_s4 + $0x20] sm:$0xff]  ;;  %v249_v55 = vld [vmem:[%s3550_s0 + $0x3f0] sm:$0xff] }
  0x65   :  { %425 = vmatmul.mubr.f32.gmra.mxu0 %v150_v2  ;;  %2240 = vmatprep.mubr.f32.mxu1 %v227_v9  ;;  %v1119_v2 = vld [vmem:[%s3551_s3 + $0x178] sm:$0xff]  ;;  %v187_v9 = vld [vmem:[%s3550_s0 + $0x200] sm:$0xff] }
  0x66   :  { %429 = vmatprep.mubr.f32.mxu0 %v154_v4  ;;  %1277 = vperm.xlu1 %2368, %v1103_v12   ;;  %v180_v4 = vld [vmem:[%s3550_s0 + $0x1c8] sm:$0xff]  ;;  %v186_v12 = vld [vmem:[%s3550_s0 + $0x1f8] sm:$0xff] }
  0x67   :  { %1282 = vperm.xlu0 %2367, %v1104_v0   ;;  %2276 = vmatpush3.msra.mxu1 %v1512_v60  ;;  %v193_v0 = vld [vmem:[%s3550_s0 + $0x230] sm:$0xff]  ;;  %v259_v60 = vld [vmem:[%s3550_s0 + $0x440] sm:$0xff] }
  0x68   :  { %2241 = vmatmul.mubr.f32.gmra.mxu1 %v230_v13  ;;  %2277 = vmatprep.subr.mxu1 %v1511_v62  ;;  %v190_v13 = vld [vmem:[%s3550_s0 + $0x218] sm:$0xff] }
  0x69   :  { %430 = vmatmul.mubr.f32.gmra.mxu0 %v153_v8  ;;  %2243 = vmatprep.mubr.f32.mxu1 %v233_v15  ;;  %v183_v8 = vld [vmem:[%s3550_s0 + $0x1e0] sm:$0xff] }
  0x6a   :  { %434 = vmatprep.mubr.f32.mxu0 %v157_v10  ;;  %1287 = vperm.xlu1 %2368, %v1105_v18   ;;  %v1507_v10 = vld [vmem:[%s3552_s4 + $0x18] sm:$0xff]  ;;  %v1504_v15 = vld [vmem:[%s3552_s4] sm:$0xff]  ;;  %v196_v18 = vld [vmem:[%s3550_s0 + $0x248] sm:$0xff] }
  0x6b   :  { %1292 = vperm.xlu0 %2367, %v1106_v24   ;;  %2278 = vmatpush3.msra.mxu1 %v1511_v62  ;;  %v205_v24 = vld [vmem:[%s3550_s0 + $0x290] sm:$0xff]  ;;  %v262_v62 = vld [vmem:[%s3550_s0 + $0x458] sm:$0xff] }
  0x6c   :  { %2244 = vmatmul.mubr.f32.gmra.mxu1 %v236_v19  ;;  %2279 = vmatprep.subr.mxu1 %v1510_v3  ;;  %v195_v19 = vld [vmem:[%s3550_s0 + $0x240] sm:$0xff] }
  0x6d   :  { %435 = vmatmul.mubr.f32.gmra.mxu0 %v156_v14  ;;  %2246 = vmatprep.mubr.f32.mxu1 %v239_v22  ;;  %v1505_v14 = vld [vmem:[%s3552_s4 + $0x8] sm:$0xff]  ;;  %v202_v22 = vld [vmem:[%s3550_s0 + $0x278] sm:$0xff] }
  0x6e   :  { %439 = vmatprep.mubr.f32.mxu0 %v160_v16  ;;  %1297 = vperm.xlu1 %2368, %v1107_v25   ;;  %v189_v16 = vld [vmem:[%s3550_s0 + $0x210] sm:$0xff]  ;;  %v204_v25 = vld [vmem:[%s3550_s0 + $0x288] sm:$0xff] }
  0x6f   :  { %1302 = vperm.xlu0 %2367, %v1108_v31   ;;  %2280 = vmatpush3.msra.mxu1 %v1510_v3  ;;  %v213_v31 = vld [vmem:[%s3550_s0 + $0x2d0] sm:$0xff] }
  0x70   :  { %2247 = vmatmul.mubr.f32.gmra.mxu1 %v242_v26  ;;  %2281 = vmatprep.subr.mxu1 %v1509_v6  ;;  %v208_v26 = vld [vmem:[%s3550_s0 + $0x2a8] sm:$0xff] }
  0x71   :  { %440 = vmatmul.mubr.f32.gmra.mxu0 %v159_v21  ;;  %2249 = vmatprep.mubr.f32.mxu1 %v245_v29  ;;  %v198_v21 = vld [vmem:[%s3550_s0 + $0x258] sm:$0xff] }
  0x72   :  { %444 = vmatprep.mubr.f32.mxu0 %v163_v23  ;;  %1307 = vperm.xlu1 %2368, %v1109_v32   ;;  %v201_v23 = vld [vmem:[%s3550_s0 + $0x270] sm:$0xff]  ;;  %v210_v29 = vld [vmem:[%s3550_s0 + $0x2b8] sm:$0xff] }
  0x73   :  { %1312 = vperm.xlu0 %2367, %v1110_v38   ;;  %2282 = vmatpush3.msra.mxu1 %v1509_v6  ;;  %v217_v32 = vld [vmem:[%s3550_s0 + $0x2f0] sm:$0xff]  ;;  %v226_v38 = vld [vmem:[%s3550_s0 + $0x338] sm:$0xff] }
  0x74   :  { %2250 = vmatmul.mubr.f32.gmra.mxu1 %v248_v33  ;;  %2283 = vmatprep.subr.mxu1 %v1508_v7  ;;  %v216_v33 = vld [vmem:[%s3550_s0 + $0x2e8] sm:$0xff] }
  0x75   :  { %445 = vmatmul.mubr.f32.gmra.mxu0 %v162_v28  ;;  %2252 = vmatprep.mubr.f32.mxu1 %v251_v36  ;;  %v211_v28 = vld [vmem:[%s3550_s0 + $0x2c0] sm:$0xff] }
  0x76   :  { %449 = vmatprep.mubr.f32.mxu0 %v166_v30  ;;  %1317 = vperm.xlu1 %2368, %v1111_v39   ;;  %v214_v30 = vld [vmem:[%s3550_s0 + $0x2d8] sm:$0xff]  ;;  %v223_v36 = vld [vmem:[%s3550_s0 + $0x320] sm:$0xff]  ;;  %v225_v39 = vld [vmem:[%s3550_s0 + $0x330] sm:$0xff] }
  0x77   :  { %1322 = vperm.xlu0 %2367, %v1112_v45   ;;  %2284 = vmatpush3.msra.mxu1 %v1508_v7  ;;  %v234_v45 = vld [vmem:[%s3550_s0 + $0x378] sm:$0xff] }
  0x78   :  { %2253 = vmatmul.mubr.f32.gmra.mxu1 %v254_v40  ;;  %2285 = vmatprep.subr.mxu1 %v1507_v10  ;;  %v229_v40 = vld [vmem:[%s3550_s0 + $0x350] sm:$0xff] }
  0x79   :  { %450 = vmatmul.mubr.f32.gmra.mxu0 %v165_v35  ;;  %2255 = vmatprep.mubr.f32.mxu1 %v257_v43  ;;  %v219_v35 = vld [vmem:[%s3550_s0 + $0x300] sm:$0xff] }
  0x7a   :  { %454 = vmatprep.mubr.f32.mxu0 %v169_v37  ;;  %1327 = vperm.xlu1 %2368, %v1113_v46   ;;  %v222_v37 = vld [vmem:[%s3550_s0 + $0x318] sm:$0xff]  ;;  %v231_v43 = vld [vmem:[%s3550_s0 + $0x360] sm:$0xff] }
  0x7b   :  { %1332 = vperm.xlu0 %2367, %v1114_v52   ;;  %2286 = vmatpush3.msra.mxu1 %v1507_v10  ;;  %v238_v46 = vld [vmem:[%s3550_s0 + $0x398] sm:$0xff]  ;;  %v247_v52 = vld [vmem:[%s3550_s0 + $0x3e0] sm:$0xff] }
  0x7c   :  { %2256 = vmatmul.mubr.f32.gmra.mxu1 %v260_v47  ;;  %2287 = vmatprep.subr.mxu1 %v1506_v11  ;;  %v237_v47 = vld [vmem:[%s3550_s0 + $0x390] sm:$0xff] }
  0x7d   :  { %455 = vmatmul.mubr.f32.gmra.mxu0 %v168_v42  ;;  %2258 = vmatprep.mubr.f32.mxu1 %v263_v50  ;;  %v232_v42 = vld [vmem:[%s3550_s0 + $0x368] sm:$0xff] }
  0x7e   :  { %459 = vmatprep.mubr.f32.mxu0 %v172_v44  ;;  %1337 = vperm.xlu1 %2368, %v1115_v53   ;;  %v235_v44 = vld [vmem:[%s3550_s0 + $0x380] sm:$0xff]  ;;  %v244_v50 = vld [vmem:[%s3550_s0 + $0x3c8] sm:$0xff]  ;;  %v246_v53 = vld [vmem:[%s3550_s0 + $0x3d8] sm:$0xff] }
  0x7f   :  { %1342 = vperm.xlu0 %2367, %v1116_v58   ;;  %2288 = vmatpush3.msra.mxu1 %v1506_v11  ;;  %v256_v58 = vld [vmem:[%s3550_s0 + $0x428] sm:$0xff] }
  0x80   :  { %2259 = vmatmul.mubr.f32.gmra.mxu1 %v266_v54  ;;  %2289 = vmatprep.subr.mxu1 %v1505_v14  ;;  %v250_v54 = vld [vmem:[%s3550_s0 + $0x3f8] sm:$0xff] }
  0x81   :  { %460 = vmatmul.mubr.f32.gmra.mxu0 %v171_v49  ;;  %2290 = vmatpush3.msra.mxu1 %v1505_v14  ;;  %v240_v49 = vld [vmem:[%s3550_s0 + $0x3a8] sm:$0xff] }
  0x82   :  { %464 = vmatprep.mubr.f32.mxu0 %v175_v51  ;;  %1347 = vperm.xlu1 %2368, %v1117_v59   ;;  %v243_v51 = vld [vmem:[%s3550_s0 + $0x3c0] sm:$0xff] }
  0x83   :  { %1352 = vperm.xlu0 %2367, %v1118_v1   ;;  %2291 = vmatprep.subr.mxu1 %v1504_v15  ;;  %v255_v59 = vld [vmem:[%s3550_s0 + $0x420] sm:$0xff]  ;;  %v265_v1 = vld [vmem:[%s3550_s0 + $0x470] sm:$0xff] }
  0x84   :  { %2292 = vmatpush3.msra.mxu1 %v1504_v15 }
  0x85   :  { %465 = vmatmul.mubr.f32.gmra.mxu0 %v174_v56  ;;  %v253_v56 = vld [vmem:[%s3550_s0 + $0x410] sm:$0xff] }
  0x86   :  { %469 = vmatprep.mubr.f32.mxu0 %v178_v57  ;;  %1357 = vperm.xlu1 %2368, %v1119_v2   ;;  %v252_v57 = vld [vmem:[%s3550_s0 + $0x408] sm:$0xff] }
  0x87   :  { %v264_v2 = vld [vmem:[%s3550_s0 + $0x468] sm:$0xff] }
  0x89   :  { %470 = vmatmul.mubr.f32.gmra.mxu0 %v177_v61  ;;  %v258_v61 = vld [vmem:[%s3550_s0 + $0x438] sm:$0xff] }
  0x8a   :  { %474 = vmatprep.mubr.f32.mxu0 %v181_v63  ;;  %v261_v63 = vld [vmem:[%s3550_s0 + $0x450] sm:$0xff] }
  0x8d   :  { %475 = vmatmul.mubr.f32.gmra.mxu0 %v180_v4 }
  0x8e   :  { %479 = vmatprep.mubr.f32.mxu0 %v184_v5 }
  0x91   :  { %480 = vmatmul.mubr.f32.gmra.mxu0 %v183_v8  ;;  %v1408_v8 = vld [vmem:[%s3553_s2] sm:$0xff] }
  0x92   :  { %484 = vmatprep.mubr.f32.mxu0 %v187_v9 }
  0x95   :  { %485 = vmatmul.mubr.f32.gmra.mxu0 %v186_v12 }
  0x96   :  { %489 = vmatprep.mubr.f32.mxu0 %v190_v13 }
  0x99   :  { %490 = vmatmul.mubr.f32.gmra.mxu0 %v189_v16  ;;  %v1409_v16 = vld [vmem:[%s3553_s2 + $0x8] sm:$0xff] }
  0x9a   :  { %494 = vmatprep.mubr.f32.mxu0 %v193_v0 }
  0x9d   :  { %495 = vmatmul.mubr.f32.gmra.mxu0 %v192_v17 }
  0x9e   :  { %499 = vmatprep.mubr.f32.mxu0 %v196_v18 }
  0xa1   :  { %500 = vmatmul.mubr.f32.gmra.mxu0 %v195_v19 }
  0xa2   :  { %504 = vmatprep.mubr.f32.mxu0 %v199_v20  ;;  %v1123_v5 = vpop.permute.xlu0 %1122 }
  0xa5   :  { %505 = vmatmul.mubr.f32.gmra.mxu0 %v198_v21  ;;  %v1133_v18 = vpop.permute.xlu1 %1132 }
  0xa6   :  { %509 = vmatprep.mubr.f32.mxu0 %v202_v22  ;;  %v1128_v13 = vpop.permute.xlu0 %1127 }
  0xa9   :  { %510 = vmatmul.mubr.f32.gmra.mxu0 %v201_v23 }
  0xaa   :  { %514 = vmatprep.mubr.f32.mxu0 %v205_v24 }
  0xad   :  { %515 = vmatmul.mubr.f32.gmra.mxu0 %v204_v25  ;;  %v1410_v25 = vld [vmem:[%s3553_s2 + $0x10] sm:$0xff] }
  0xae   :  { %519 = vmatprep.mubr.f32.mxu0 %v208_v26 }
  0xb1   :  { %520 = vmatmul.mubr.f32.gmra.mxu0 %v207_v27 }
  0xb2   :  { %524 = vmatprep.mubr.f32.mxu0 %v211_v28  ;;  %v1138_v28 = vpop.permute.xlu1 %1137 }
  0xb5   :  { %525 = vmatmul.mubr.f32.gmra.mxu0 %v210_v29 }
  0xb6   :  { %529 = vmatprep.mubr.f32.mxu0 %v214_v30 }
  0xb9   :  { %530 = vmatmul.mubr.f32.gmra.mxu0 %v213_v31 }
  0xba   :  { %534 = vmatprep.mubr.f32.mxu0 %v217_v32 }
  0xbd   :  { %535 = vmatmul.mubr.f32.gmra.mxu0 %v216_v33  ;;  %v1411_v33 = vld [vmem:[%s3553_s2 + $0x18] sm:$0xff] }
  0xbe   :  { %539 = vmatprep.mubr.f32.mxu0 %v220_v34 }
  0xc1   :  { %540 = vmatmul.mubr.f32.gmra.mxu0 %v219_v35 }
  0xc2   :  { %544 = vmatprep.mubr.f32.mxu0 %v223_v36  ;;  %v1143_v36 = vpop.permute.xlu0 %1142 }
  0xc5   :  { %545 = vmatmul.mubr.f32.gmra.mxu0 %v222_v37 }
  0xc6   :  { %549 = vmatprep.mubr.f32.mxu0 %v226_v38 }
  0xc9   :  { %550 = vmatmul.mubr.f32.gmra.mxu0 %v225_v39 }
  0xca   :  { %554 = vmatprep.mubr.f32.mxu0 %v229_v40 }
  0xcd   :  { %555 = vmatmul.mubr.f32.gmra.mxu0 %v228_v41  ;;  %v1412_v41 = vld [vmem:[%s3553_s2 + $0x20] sm:$0xff] }
  0xce   :  { %559 = vmatprep.mubr.f32.mxu0 %v232_v42 }
  0xd1   :  { %560 = vmatmul.mubr.f32.gmra.mxu0 %v231_v43 }
  0xd2   :  { %564 = vmatprep.mubr.f32.mxu0 %v235_v44  ;;  %v1148_v44 = vpop.permute.xlu1 %1147 }
  0xd5   :  { %565 = vmatmul.mubr.f32.gmra.mxu0 %v234_v45 }
  0xd6   :  { %569 = vmatprep.mubr.f32.mxu0 %v238_v46 }
  0xd9   :  { %570 = vmatmul.mubr.f32.gmra.mxu0 %v237_v47 }
  0xda   :  { %574 = vmatprep.mubr.f32.mxu0 %v241_v48 }
  0xdd   :  { %575 = vmatmul.mubr.f32.gmra.mxu0 %v240_v49  ;;  %v1413_v49 = vld [vmem:[%s3553_s2 + $0x28] sm:$0xff] }
  0xde   :  { %579 = vmatprep.mubr.f32.mxu0 %v244_v50 }
  0xe1   :  { %580 = vmatmul.mubr.f32.gmra.mxu0 %v243_v51 }
  0xe2   :  { %584 = vmatprep.mubr.f32.mxu0 %v247_v52  ;;  %v1153_v52 = vpop.permute.xlu0 %1152 }
  0xe4   :  { %v2191_v3 = vpop.f32.mrf.mxu1 }
  0xe5   :  { %585 = vmatmul.mubr.f32.gmra.mxu0 %v246_v53 }
  0xe6   :  { %589 = vmatprep.mubr.f32.mxu0 %v250_v54  ;;  %v686_v4 = vpop.f32.mrf.mxu1 }
  0xe8   :  { %v2194_v10 = vpop.f32.mrf.mxu1 }
  0xe9   :  { %590 = vmatmul.mubr.f32.gmra.mxu0 %v249_v55 }
  0xea   :  { %594 = vmatprep.mubr.f32.mxu0 %v253_v56  ;;  %v696_v17 = vpop.f32.mrf.mxu1 }
  0xec   :  { %v2197_v24 = vpop.f32.mrf.mxu1 }
  0xed   :  { %595 = vmatmul.mubr.f32.gmra.mxu0 %v252_v57  ;;  %v1414_v57 = vld [vmem:[%s3553_s2 + $0x30] sm:$0xff] }
  0xee   :  { %599 = vmatprep.mubr.f32.mxu0 %v256_v58  ;;  %v706_v32 = vpop.f32.mrf.mxu1 }
  0xf0   :  { %v2200_v40 = vpop.f32.mrf.mxu1 }
  0xf1   :  { %600 = vmatmul.mubr.f32.gmra.mxu0 %v255_v59 }
  0xf2   :  { %604 = vmatprep.mubr.f32.mxu0 %v259_v60  ;;  %v716_v48 = vpop.f32.mrf.mxu1  ;;  %v1158_v60 = vpop.permute.xlu1 %1157 }
  0xf4   :  { %v2203_v56 = vpop.f32.mrf.mxu1 }
  0xf5   :  { %605 = vmatmul.mubr.f32.gmra.mxu0 %v258_v61 }
  0xf6   :  { %609 = vmatprep.mubr.f32.mxu0 %v262_v62 }
  0xf9   :  { %610 = vmatmul.mubr.f32.gmra.mxu0 %v261_v63 }
  0xfa   :  { %614 = vmatprep.mubr.f32.mxu0 %v265_v1  ;;  %v726_v1 = vpop.f32.mrf.mxu1 }
  0xfd   :  { %615 = vmatmul.mubr.f32.gmra.mxu0 %v264_v2  ;;  %v1415_v2 = vld [vmem:[%s3553_s2 + $0x38] sm:$0xff] }
 0x101   :  { %v381_v6 = vpop.f32.mrf.mxu0 }
 0x102   :  { %v687_v7 = vadd.f32 %v686_v4, %v381_v6 }
 0x103   :  { %v383_v9 = vpop.f32.mrf.mxu0 }
 0x104   :  { %v1360_v11 = vmul.f32 %v1123_v5, %v687_v7  ;;  %v1163_v5 = vpop.permute.xlu0 %1162  ;;  %v2206_v9 = vpop.f32.mrf.mxu1 }
 0x105   :  { %v386_v12 = vpop.f32.mrf.mxu0 }
 0x106   :  { %v1456_v14 = vadd.f32 %v1408_v8, %v1360_v11  ;;  %v692_v15 = vadd.f32 %v2191_v3, %v386_v12 }
 0x107   :  { %v388_v0 = vpop.f32.mrf.mxu0 }
 0x108   :  { %v1361_v19 = vmul.f32 %v1128_v13, %v692_v15  ;;  %2293 = vmatprep.mubr.f32.mxu1 %v1456_v14  ;;  %v1168_v13 = vpop.permute.xlu1 %1167  ;;  %v736_v0 = vpop.f32.mrf.mxu1 }
 0x109   :  { %v391_v20 = vpop.f32.mrf.mxu0 }
 0x10a   :  { %v1457_v21 = vadd.f32 %v1409_v16, %v1361_v19  ;;  %v697_v22 = vadd.f32 %v696_v17, %v391_v20  ;;  %v1417_v17 = vld [vmem:[%s3553_s2 + $0x48] sm:$0xff]  ;;  %v1173_v20 = vpop.permute.xlu0 %1172 }
 0x10b   :  { %v393_v23 = vpop.f32.mrf.mxu0 }
 0x10c   :  { %v1362_v26 = vmul.f32 %v1133_v18, %v697_v22  ;;  %2294 = vmatmul.mubr.f32.vlgmr.msra.gmra.mxu1 %v1457_v21 }
 0x10d   :  { %v396_v27 = vpop.f32.mrf.mxu0 }
 0x10e   :  { %v702_v29 = vadd.f32 %v2194_v10, %v396_v27  ;;  %v1458_v30 = vadd.f32 %v1410_v25, %v1362_v26  ;;  %v1416_v10 = vld [vmem:[%s3553_s2 + $0x40] sm:$0xff]  ;;  %v1418_v25 = vld [vmem:[%s3553_s2 + $0x50] sm:$0xff] }
 0x10f   :  { %v398_v31 = vpop.f32.mrf.mxu0 }
 0x110   :  { %v1363_v34 = vmul.f32 %v1138_v28, %v702_v29  ;;  %2296 = vmatprep.mubr.f32.mxu1 %v1458_v30  ;;  %v1178_v28 = vpop.permute.xlu1 %1177 }
 0x111   :  { %v401_v35 = vpop.f32.mrf.mxu0 }
 0x112   :  { %v707_v37 = vadd.f32 %v706_v32, %v401_v35  ;;  %v1459_v38 = vadd.f32 %v1411_v33, %v1363_v34  ;;  %v1419_v33 = vld [vmem:[%s3553_s2 + $0x58] sm:$0xff] }
 0x113   :  { %v403_v39 = vpop.f32.mrf.mxu0 }
 0x114   :  { %v1364_v42 = vmul.f32 %v1143_v36, %v707_v37  ;;  %2297 = vmatmul.mubr.f32.gmra.mxu1 %v1459_v38  ;;  %v1183_v36 = vpop.permute.xlu0 %1182 }
 0x115   :  { %v406_v43 = vpop.f32.mrf.mxu0 }
 0x116   :  { %v712_v45 = vadd.f32 %v2197_v24, %v406_v43  ;;  %v1460_v46 = vadd.f32 %v1412_v41, %v1364_v42  ;;  %v2209_v24 = vpop.f32.mrf.mxu1  ;;  %v1420_v41 = vld [vmem:[%s3553_s2 + $0x60] sm:$0xff] }
 0x117   :  { %v408_v47 = vpop.f32.mrf.mxu0 }
 0x118   :  { %v1365_v50 = vmul.f32 %v1148_v44, %v712_v45  ;;  %2299 = vmatprep.mubr.f32.mxu1 %v1460_v46  ;;  %v746_v32 = vpop.f32.mrf.mxu1  ;;  %v1188_v44 = vpop.permute.xlu1 %1187 }
 0x119   :  { %v411_v51 = vpop.f32.mrf.mxu0 }
 0x11a   :  { %v717_v53 = vadd.f32 %v716_v48, %v411_v51  ;;  %v1461_v54 = vadd.f32 %v1413_v49, %v1365_v50  ;;  %v1421_v49 = vld [vmem:[%s3553_s2 + $0x68] sm:$0xff] }
 0x11b   :  { %v413_v55 = vpop.f32.mrf.mxu0 }
 0x11c   :  { %v1366_v58 = vmul.f32 %v1153_v52, %v717_v53  ;;  %2300 = vmatmul.mubr.f32.gmra.mxu1 %v1461_v54  ;;  %v1193_v52 = vpop.permute.xlu0 %1192 }
 0x11d   :  { %v416_v59 = vpop.f32.mrf.mxu0 }
 0x11e   :  { %v722_v61 = vadd.f32 %v2200_v40, %v416_v59  ;;  %v1462_v62 = vadd.f32 %v1414_v57, %v1366_v58  ;;  %v2212_v40 = vpop.f32.mrf.mxu1  ;;  %v1422_v57 = vld [vmem:[%s3553_s2 + $0x70] sm:$0xff] }
 0x11f   :  { %v418_v63 = vpop.f32.mrf.mxu0 }
 0x120   :  { %v1367_v3 = vmul.f32 %v1158_v60, %v722_v61  ;;  %2302 = vmatprep.mubr.f32.mxu1 %v1462_v62  ;;  %v756_v48 = vpop.f32.mrf.mxu1  ;;  %v1198_v60 = vpop.permute.xlu1 %1197 }
 0x121   :  { %v421_v4 = vpop.f32.mrf.mxu0 }
 0x122   :  { %v727_v6 = vadd.f32 %v726_v1, %v421_v4  ;;  %v1463_v7 = vadd.f32 %v1415_v2, %v1367_v3  ;;  %v1423_v2 = vld [vmem:[%s3553_s2 + $0x78] sm:$0xff] }
 0x123   :  { %v423_v8 = vpop.f32.mrf.mxu0 }
 0x124   :  { %v1368_v11 = vmul.f32 %v1163_v5, %v727_v6  ;;  %2303 = vmatmul.mubr.f32.gmra.mxu1 %v1463_v7  ;;  %v1203_v5 = vpop.permute.xlu0 %1202 }
 0x125   :  { %v426_v12 = vpop.f32.mrf.mxu0 }
 0x126   :  { %v732_v14 = vadd.f32 %v2203_v56, %v426_v12  ;;  %v1464_v15 = vadd.f32 %v1416_v10, %v1368_v11  ;;  %v2215_v56 = vpop.f32.mrf.mxu1  ;;  %v1424_v10 = vld [vmem:[%s3553_s2 + $0x80] sm:$0xff] }
 0x127   :  { %v428_v16 = vpop.f32.mrf.mxu0 }
 0x128   :  { %v1369_v18 = vmul.f32 %v1168_v13, %v732_v14  ;;  %2305 = vmatprep.mubr.f32.mxu1 %v1464_v15  ;;  %v766_v1 = vpop.f32.mrf.mxu1  ;;  %v1208_v13 = vpop.permute.xlu1 %1207 }
 0x129   :  { %v431_v19 = vpop.f32.mrf.mxu0 }
 0x12a   :  { %v737_v21 = vadd.f32 %v736_v0, %v431_v19  ;;  %v1465_v22 = vadd.f32 %v1417_v17, %v1369_v18  ;;  %v1425_v17 = vld [vmem:[%s3553_s2 + $0x88] sm:$0xff] }
 0x12b   :  { %v433_v23 = vpop.f32.mrf.mxu0 }
 0x12c   :  { %v1370_v26 = vmul.f32 %v1173_v20, %v737_v21  ;;  %2306 = vmatmul.mubr.f32.gmra.mxu1 %v1465_v22  ;;  %v1213_v20 = vpop.permute.xlu0 %1212 }
 0x12d   :  { %v436_v27 = vpop.f32.mrf.mxu0 }
 0x12e   :  { %v742_v29 = vadd.f32 %v2206_v9, %v436_v27  ;;  %v1466_v30 = vadd.f32 %v1418_v25, %v1370_v26  ;;  %v2218_v9 = vpop.f32.mrf.mxu1  ;;  %v1426_v25 = vld [vmem:[%s3553_s2 + $0x90] sm:$0xff] }
 0x12f   :  { %v438_v31 = vpop.f32.mrf.mxu0 }
 0x130   :  { %v1371_v34 = vmul.f32 %v1178_v28, %v742_v29  ;;  %2308 = vmatprep.mubr.f32.mxu1 %v1466_v30  ;;  %v776_v0 = vpop.f32.mrf.mxu1  ;;  %v1218_v28 = vpop.permute.xlu1 %1217 }
 0x131   :  { %v441_v35 = vpop.f32.mrf.mxu0 }
 0x132   :  { %v747_v37 = vadd.f32 %v746_v32, %v441_v35  ;;  %v1467_v38 = vadd.f32 %v1419_v33, %v1371_v34  ;;  %v1427_v33 = vld [vmem:[%s3553_s2 + $0x98] sm:$0xff] }
 0x133   :  { %v443_v39 = vpop.f32.mrf.mxu0 }
 0x134   :  { %v1372_v42 = vmul.f32 %v1183_v36, %v747_v37  ;;  %2309 = vmatmul.mubr.f32.gmra.mxu1 %v1467_v38  ;;  %v1223_v36 = vpop.permute.xlu0 %1222 }
 0x135   :  { %v446_v43 = vpop.f32.mrf.mxu0 }
 0x136   :  { %v752_v45 = vadd.f32 %v2209_v24, %v446_v43  ;;  %v1468_v46 = vadd.f32 %v1420_v41, %v1372_v42  ;;  %v2221_v24 = vpop.f32.mrf.mxu1  ;;  %v1428_v41 = vld [vmem:[%s3553_s2 + $0xa0] sm:$0xff] }
 0x137   :  { %v448_v47 = vpop.f32.mrf.mxu0 }
 0x138   :  { %v1373_v50 = vmul.f32 %v1188_v44, %v752_v45  ;;  %2311 = vmatprep.mubr.f32.mxu1 %v1468_v46  ;;  %v786_v32 = vpop.f32.mrf.mxu1  ;;  %v1228_v44 = vpop.permute.xlu1 %1227 }
 0x139   :  { %v451_v51 = vpop.f32.mrf.mxu0 }
 0x13a   :  { %v757_v53 = vadd.f32 %v756_v48, %v451_v51  ;;  %v1469_v54 = vadd.f32 %v1421_v49, %v1373_v50  ;;  %v1429_v49 = vld [vmem:[%s3553_s2 + $0xa8] sm:$0xff] }
 0x13b   :  { %v453_v55 = vpop.f32.mrf.mxu0 }
 0x13c   :  { %v1374_v58 = vmul.f32 %v1193_v52, %v757_v53  ;;  %2312 = vmatmul.mubr.f32.gmra.mxu1 %v1469_v54  ;;  %v1233_v52 = vpop.permute.xlu0 %1232 }
 0x13d   :  { %v456_v59 = vpop.f32.mrf.mxu0 }
 0x13e   :  { %v762_v61 = vadd.f32 %v2212_v40, %v456_v59  ;;  %v1470_v62 = vadd.f32 %v1422_v57, %v1374_v58  ;;  %v2224_v40 = vpop.f32.mrf.mxu1  ;;  %v1430_v57 = vld [vmem:[%s3553_s2 + $0xb0] sm:$0xff] }
 0x13f   :  { %v458_v63 = vpop.f32.mrf.mxu0 }
 0x140   :  { %v1375_v3 = vmul.f32 %v1198_v60, %v762_v61  ;;  %2314 = vmatprep.mubr.f32.mxu1 %v1470_v62  ;;  %v796_v48 = vpop.f32.mrf.mxu1  ;;  %v1238_v60 = vpop.permute.xlu1 %1237 }
 0x141   :  { %v461_v4 = vpop.f32.mrf.mxu0 }
 0x142   :  { %v767_v6 = vadd.f32 %v766_v1, %v461_v4  ;;  %v1471_v7 = vadd.f32 %v1423_v2, %v1375_v3  ;;  %v1431_v2 = vld [vmem:[%s3553_s2 + $0xb8] sm:$0xff] }
 0x143   :  { %v463_v8 = vpop.f32.mrf.mxu0 }
 0x144   :  { %v1376_v11 = vmul.f32 %v1203_v5, %v767_v6  ;;  %2315 = vmatmul.mubr.f32.gmra.mxu1 %v1471_v7  ;;  %v1243_v5 = vpop.permute.xlu0 %1242 }
 0x145   :  { %v466_v12 = vpop.f32.mrf.mxu0 }
 0x146   :  { %v772_v14 = vadd.f32 %v2215_v56, %v466_v12  ;;  %v1472_v15 = vadd.f32 %v1424_v10, %v1376_v11  ;;  %v2227_v56 = vpop.f32.mrf.mxu1  ;;  %v1432_v10 = vld [vmem:[%s3553_s2 + $0xc0] sm:$0xff] }
 0x147   :  { %v468_v16 = vpop.f32.mrf.mxu0 }
 0x148   :  { %v1377_v18 = vmul.f32 %v1208_v13, %v772_v14  ;;  %2317 = vmatprep.mubr.f32.mxu1 %v1472_v15  ;;  %v806_v1 = vpop.f32.mrf.mxu1  ;;  %v1248_v13 = vpop.permute.xlu1 %1247 }
 0x149   :  { %v471_v19 = vpop.f32.mrf.mxu0 }
 0x14a   :  { %v777_v21 = vadd.f32 %v776_v0, %v471_v19  ;;  %v1473_v22 = vadd.f32 %v1425_v17, %v1377_v18  ;;  %v1433_v17 = vld [vmem:[%s3553_s2 + $0xc8] sm:$0xff] }
 0x14b   :  { %v473_v23 = vpop.f32.mrf.mxu0 }
 0x14c   :  { %v1378_v26 = vmul.f32 %v1213_v20, %v777_v21  ;;  %2318 = vmatmul.mubr.f32.gmra.mxu1 %v1473_v22  ;;  %v1253_v20 = vpop.permute.xlu0 %1252 }
 0x14d   :  { %v476_v27 = vpop.f32.mrf.mxu0 }
 0x14e   :  { %v782_v29 = vadd.f32 %v2218_v9, %v476_v27  ;;  %v1474_v30 = vadd.f32 %v1426_v25, %v1378_v26  ;;  %v2230_v9 = vpop.f32.mrf.mxu1  ;;  %v1434_v25 = vld [vmem:[%s3553_s2 + $0xd0] sm:$0xff] }
 0x14f   :  { %v478_v31 = vpop.f32.mrf.mxu0 }
 0x150   :  { %v1379_v34 = vmul.f32 %v1218_v28, %v782_v29  ;;  %2320 = vmatprep.mubr.f32.mxu1 %v1474_v30  ;;  %v816_v0 = vpop.f32.mrf.mxu1  ;;  %v1258_v28 = vpop.permute.xlu1 %1257 }
 0x151   :  { %v481_v35 = vpop.f32.mrf.mxu0 }
 0x152   :  { %v787_v37 = vadd.f32 %v786_v32, %v481_v35  ;;  %v1475_v38 = vadd.f32 %v1427_v33, %v1379_v34  ;;  %v1435_v33 = vld [vmem:[%s3553_s2 + $0xd8] sm:$0xff] }
 0x153   :  { %v483_v39 = vpop.f32.mrf.mxu0 }
 0x154   :  { %v1380_v42 = vmul.f32 %v1223_v36, %v787_v37  ;;  %2321 = vmatmul.mubr.f32.gmra.mxu1 %v1475_v38  ;;  %v1263_v36 = vpop.permute.xlu0 %1262 }
 0x155   :  { %v486_v43 = vpop.f32.mrf.mxu0 }
 0x156   :  { %v792_v45 = vadd.f32 %v2221_v24, %v486_v43  ;;  %v1476_v46 = vadd.f32 %v1428_v41, %v1380_v42  ;;  %v2233_v24 = vpop.f32.mrf.mxu1  ;;  %v1436_v41 = vld [vmem:[%s3553_s2 + $0xe0] sm:$0xff] }
 0x157   :  { %v488_v47 = vpop.f32.mrf.mxu0 }
 0x158   :  { %v1381_v50 = vmul.f32 %v1228_v44, %v792_v45  ;;  %2323 = vmatprep.mubr.f32.mxu1 %v1476_v46  ;;  %v826_v32 = vpop.f32.mrf.mxu1  ;;  %v1268_v44 = vpop.permute.xlu1 %1267 }
 0x159   :  { %v491_v51 = vpop.f32.mrf.mxu0 }
 0x15a   :  { %v797_v53 = vadd.f32 %v796_v48, %v491_v51  ;;  %v1477_v54 = vadd.f32 %v1429_v49, %v1381_v50  ;;  %v1437_v49 = vld [vmem:[%s3553_s2 + $0xe8] sm:$0xff] }
 0x15b   :  { %v493_v55 = vpop.f32.mrf.mxu0 }
 0x15c   :  { %v1382_v58 = vmul.f32 %v1233_v52, %v797_v53  ;;  %2324 = vmatmul.mubr.f32.gmra.mxu1 %v1477_v54  ;;  %v1273_v52 = vpop.permute.xlu0 %1272 }
 0x15d   :  { %v496_v59 = vpop.f32.mrf.mxu0 }
 0x15e   :  { %v802_v61 = vadd.f32 %v2224_v40, %v496_v59  ;;  %v1478_v62 = vadd.f32 %v1430_v57, %v1382_v58  ;;  %v2236_v40 = vpop.f32.mrf.mxu1  ;;  %v1438_v57 = vld [vmem:[%s3553_s2 + $0xf0] sm:$0xff] }
 0x15f   :  { %v498_v63 = vpop.f32.mrf.mxu0 }
 0x160   :  { %v1383_v3 = vmul.f32 %v1238_v60, %v802_v61  ;;  %2326 = vmatprep.mubr.f32.mxu1 %v1478_v62  ;;  %v836_v48 = vpop.f32.mrf.mxu1  ;;  %v1278_v60 = vpop.permute.xlu1 %1277 }
 0x161   :  { %v501_v4 = vpop.f32.mrf.mxu0 }
 0x162   :  { %v807_v6 = vadd.f32 %v806_v1, %v501_v4  ;;  %v1479_v7 = vadd.f32 %v1431_v2, %v1383_v3  ;;  %v1439_v2 = vld [vmem:[%s3553_s2 + $0xf8] sm:$0xff] }
 0x163   :  { %v503_v8 = vpop.f32.mrf.mxu0 }
 0x164   :  { %v1384_v11 = vmul.f32 %v1243_v5, %v807_v6  ;;  %2327 = vmatmul.mubr.f32.gmra.mxu1 %v1479_v7  ;;  %v1283_v5 = vpop.permute.xlu0 %1282 }
 0x165   :  { %v506_v12 = vpop.f32.mrf.mxu0 }
 0x166   :  { %v812_v14 = vadd.f32 %v2227_v56, %v506_v12  ;;  %v1480_v15 = vadd.f32 %v1432_v10, %v1384_v11  ;;  %v2239_v56 = vpop.f32.mrf.mxu1  ;;  %v1440_v10 = vld [vmem:[%s3553_s2 + $0x100] sm:$0xff] }
 0x167   :  { %v508_v16 = vpop.f32.mrf.mxu0 }
 0x168   :  { %v1385_v18 = vmul.f32 %v1248_v13, %v812_v14  ;;  %2329 = vmatprep.mubr.f32.mxu1 %v1480_v15  ;;  %v846_v1 = vpop.f32.mrf.mxu1  ;;  %v1288_v13 = vpop.permute.xlu1 %1287 }
 0x169   :  { %v511_v19 = vpop.f32.mrf.mxu0 }
 0x16a   :  { %v817_v21 = vadd.f32 %v816_v0, %v511_v19  ;;  %v1481_v22 = vadd.f32 %v1433_v17, %v1385_v18  ;;  %v1441_v17 = vld [vmem:[%s3553_s2 + $0x108] sm:$0xff] }
 0x16b   :  { %v513_v23 = vpop.f32.mrf.mxu0 }
 0x16c   :  { %v1386_v26 = vmul.f32 %v1253_v20, %v817_v21  ;;  %2330 = vmatmul.mubr.f32.gmra.mxu1 %v1481_v22  ;;  %v1293_v20 = vpop.permute.xlu0 %1292 }
 0x16d   :  { %v516_v27 = vpop.f32.mrf.mxu0 }
 0x16e   :  { %v822_v29 = vadd.f32 %v2230_v9, %v516_v27  ;;  %v1482_v30 = vadd.f32 %v1434_v25, %v1386_v26  ;;  %v2242_v9 = vpop.f32.mrf.mxu1  ;;  %v1442_v25 = vld [vmem:[%s3553_s2 + $0x110] sm:$0xff] }
 0x16f   :  { %v518_v31 = vpop.f32.mrf.mxu0 }
 0x170   :  { %v1387_v34 = vmul.f32 %v1258_v28, %v822_v29  ;;  %2332 = vmatprep.mubr.f32.mxu1 %v1482_v30  ;;  %v856_v0 = vpop.f32.mrf.mxu1  ;;  %v1298_v28 = vpop.permute.xlu1 %1297 }
 0x171   :  { %v521_v35 = vpop.f32.mrf.mxu0 }
 0x172   :  { %v827_v37 = vadd.f32 %v826_v32, %v521_v35  ;;  %v1483_v38 = vadd.f32 %v1435_v33, %v1387_v34  ;;  %v1443_v33 = vld [vmem:[%s3553_s2 + $0x118] sm:$0xff] }
 0x173   :  { %v523_v39 = vpop.f32.mrf.mxu0 }
 0x174   :  { %v1388_v42 = vmul.f32 %v1263_v36, %v827_v37  ;;  %2333 = vmatmul.mubr.f32.gmra.mxu1 %v1483_v38  ;;  %v1303_v36 = vpop.permute.xlu0 %1302 }
 0x175   :  { %v526_v43 = vpop.f32.mrf.mxu0 }
 0x176   :  { %v832_v45 = vadd.f32 %v2233_v24, %v526_v43  ;;  %v1484_v46 = vadd.f32 %v1436_v41, %v1388_v42  ;;  %v2245_v24 = vpop.f32.mrf.mxu1  ;;  %v1444_v41 = vld [vmem:[%s3553_s2 + $0x120] sm:$0xff] }
 0x177   :  { %v528_v47 = vpop.f32.mrf.mxu0 }
 0x178   :  { %v1389_v50 = vmul.f32 %v1268_v44, %v832_v45  ;;  %2335 = vmatprep.mubr.f32.mxu1 %v1484_v46  ;;  %v866_v32 = vpop.f32.mrf.mxu1  ;;  %v1308_v44 = vpop.permute.xlu1 %1307 }
 0x179   :  { %v531_v51 = vpop.f32.mrf.mxu0 }
 0x17a   :  { %v837_v53 = vadd.f32 %v836_v48, %v531_v51  ;;  %v1485_v54 = vadd.f32 %v1437_v49, %v1389_v50  ;;  %v1445_v49 = vld [vmem:[%s3553_s2 + $0x128] sm:$0xff] }
 0x17b   :  { %v533_v55 = vpop.f32.mrf.mxu0 }
 0x17c   :  { %v1390_v58 = vmul.f32 %v1273_v52, %v837_v53  ;;  %2336 = vmatmul.mubr.f32.gmra.mxu1 %v1485_v54  ;;  %v1313_v52 = vpop.permute.xlu0 %1312 }
 0x17d   :  { %v536_v59 = vpop.f32.mrf.mxu0 }
 0x17e   :  { %v842_v61 = vadd.f32 %v2236_v40, %v536_v59  ;;  %v1486_v62 = vadd.f32 %v1438_v57, %v1390_v58  ;;  %v2248_v40 = vpop.f32.mrf.mxu1  ;;  %v1446_v57 = vld [vmem:[%s3553_s2 + $0x130] sm:$0xff] }
 0x17f   :  { %v538_v63 = vpop.f32.mrf.mxu0 }
 0x180   :  { %v1391_v3 = vmul.f32 %v1278_v60, %v842_v61  ;;  %2338 = vmatprep.mubr.f32.mxu1 %v1486_v62  ;;  %v876_v48 = vpop.f32.mrf.mxu1  ;;  %v1318_v60 = vpop.permute.xlu1 %1317 }
 0x181   :  { %v541_v4 = vpop.f32.mrf.mxu0 }
 0x182   :  { %v847_v6 = vadd.f32 %v846_v1, %v541_v4  ;;  %v1487_v7 = vadd.f32 %v1439_v2, %v1391_v3  ;;  %v1447_v2 = vld [vmem:[%s3553_s2 + $0x138] sm:$0xff] }
 0x183   :  { %v543_v8 = vpop.f32.mrf.mxu0 }
 0x184   :  { %v1392_v11 = vmul.f32 %v1283_v5, %v847_v6  ;;  %2339 = vmatmul.mubr.f32.gmra.mxu1 %v1487_v7  ;;  %v1323_v5 = vpop.permute.xlu0 %1322 }
 0x185   :  { %v546_v12 = vpop.f32.mrf.mxu0 }
 0x186   :  { %v852_v14 = vadd.f32 %v2239_v56, %v546_v12  ;;  %v1488_v15 = vadd.f32 %v1440_v10, %v1392_v11  ;;  %v2251_v56 = vpop.f32.mrf.mxu1  ;;  %v1448_v10 = vld [vmem:[%s3553_s2 + $0x140] sm:$0xff] }
 0x187   :  { %v548_v16 = vpop.f32.mrf.mxu0 }
 0x188   :  { %v1393_v18 = vmul.f32 %v1288_v13, %v852_v14  ;;  %2341 = vmatprep.mubr.f32.mxu1 %v1488_v15  ;;  %v886_v1 = vpop.f32.mrf.mxu1  ;;  %v1328_v13 = vpop.permute.xlu1 %1327 }
 0x189   :  { %v551_v19 = vpop.f32.mrf.mxu0 }
 0x18a   :  { %v857_v21 = vadd.f32 %v856_v0, %v551_v19  ;;  %v1489_v22 = vadd.f32 %v1441_v17, %v1393_v18  ;;  %v1449_v17 = vld [vmem:[%s3553_s2 + $0x148] sm:$0xff] }
 0x18b   :  { %v553_v23 = vpop.f32.mrf.mxu0 }
 0x18c   :  { %v1394_v26 = vmul.f32 %v1293_v20, %v857_v21  ;;  %2342 = vmatmul.mubr.f32.gmra.mxu1 %v1489_v22  ;;  %v1333_v20 = vpop.permute.xlu0 %1332 }
 0x18d   :  { %v556_v27 = vpop.f32.mrf.mxu0 }
 0x18e   :  { %v862_v29 = vadd.f32 %v2242_v9, %v556_v27  ;;  %v1490_v30 = vadd.f32 %v1442_v25, %v1394_v26  ;;  %v2254_v9 = vpop.f32.mrf.mxu1  ;;  %v1450_v25 = vld [vmem:[%s3553_s2 + $0x150] sm:$0xff] }
 0x18f   :  { %v558_v31 = vpop.f32.mrf.mxu0 }
 0x190   :  { %v1395_v34 = vmul.f32 %v1298_v28, %v862_v29  ;;  %2344 = vmatprep.mubr.f32.mxu1 %v1490_v30  ;;  %v896_v0 = vpop.f32.mrf.mxu1  ;;  %v1338_v28 = vpop.permute.xlu1 %1337 }
 0x191   :  { %v561_v35 = vpop.f32.mrf.mxu0 }
 0x192   :  { %v867_v37 = vadd.f32 %v866_v32, %v561_v35  ;;  %v1491_v38 = vadd.f32 %v1443_v33, %v1395_v34  ;;  %v1451_v33 = vld [vmem:[%s3553_s2 + $0x158] sm:$0xff] }
 0x193   :  { %v563_v39 = vpop.f32.mrf.mxu0 }
 0x194   :  { %v1396_v42 = vmul.f32 %v1303_v36, %v867_v37  ;;  %2345 = vmatmul.mubr.f32.gmra.mxu1 %v1491_v38  ;;  %v1343_v36 = vpop.permute.xlu0 %1342 }
 0x195   :  { %v566_v43 = vpop.f32.mrf.mxu0 }
 0x196   :  { %v872_v45 = vadd.f32 %v2245_v24, %v566_v43  ;;  %v1492_v46 = vadd.f32 %v1444_v41, %v1396_v42  ;;  %v2257_v24 = vpop.f32.mrf.mxu1  ;;  %v1452_v41 = vld [vmem:[%s3553_s2 + $0x160] sm:$0xff] }
 0x197   :  { %v568_v47 = vpop.f32.mrf.mxu0 }
 0x198   :  { %v1397_v50 = vmul.f32 %v1308_v44, %v872_v45  ;;  %2347 = vmatprep.mubr.f32.mxu1 %v1492_v46  ;;  %v906_v32 = vpop.f32.mrf.mxu1  ;;  %v1348_v44 = vpop.permute.xlu1 %1347 }
 0x199   :  { %v571_v51 = vpop.f32.mrf.mxu0 }
 0x19a   :  { %v877_v53 = vadd.f32 %v876_v48, %v571_v51  ;;  %v1493_v54 = vadd.f32 %v1445_v49, %v1397_v50  ;;  %v1453_v49 = vld [vmem:[%s3553_s2 + $0x168] sm:$0xff] }
 0x19b   :  { %v573_v55 = vpop.f32.mrf.mxu0 }
 0x19c   :  { %v1398_v58 = vmul.f32 %v1313_v52, %v877_v53  ;;  %2348 = vmatmul.mubr.f32.gmra.mxu1 %v1493_v54  ;;  %v1353_v54 = vpop.permute.xlu0 %1352 }
 0x19d   :  { %v576_v59 = vpop.f32.mrf.mxu0 }
 0x19e   :  { %v882_v61 = vadd.f32 %v2248_v40, %v576_v59  ;;  %v1494_v62 = vadd.f32 %v1446_v57, %v1398_v58  ;;  %v2260_v40 = vpop.f32.mrf.mxu1 }
 0x19f   :  { %v578_v63 = vpop.f32.mrf.mxu0 }
 0x1a0   :  { %v1399_v3 = vmul.f32 %v1318_v60, %v882_v61  ;;  %2350 = vmatprep.mubr.f32.mxu1 %v1494_v62  ;;  %v916_v48 = vpop.f32.mrf.mxu1  ;;  %v1358_v61 = vpop.permute.xlu1 %1357  ;;  %v1455_v63 = vld [vmem:[%s3553_s2 + $0x178] sm:$0xff] }
 0x1a1   :  { %v581_v4 = vpop.f32.mrf.mxu0 }
 0x1a2   :  { %v887_v6 = vadd.f32 %v886_v1, %v581_v4  ;;  %v1495_v7 = vadd.f32 %v1447_v2, %v1399_v3  ;;  %v3355_v3 = vld [vmem:[%s3554_s5] ss:$0 sm:$0xff] }
 0x1a3   :  { %v583_v8 = vpop.f32.mrf.mxu0 }
 0x1a4   :  { %v1400_v11 = vmul.f32 %v1323_v5, %v887_v6  ;;  %2351 = vmatmul.mubr.f32.gmra.mxu1 %v1495_v7 }
 0x1a5   :  { %v586_v12 = vpop.f32.mrf.mxu0 }
 0x1a6   :  { %v892_v14 = vadd.f32 %v2251_v56, %v586_v12  ;;  %v1496_v15 = vadd.f32 %v1448_v10, %v1400_v11  ;;  %v1454_v56 = vld [vmem:[%s3553_s2 + $0x170] sm:$0xff] }
 0x1a7   :  { %v588_v16 = vpop.f32.mrf.mxu0 }
 0x1a8   :  { %v1401_v18 = vmul.f32 %v1328_v13, %v892_v14  ;;  %2353 = vmatprep.mubr.f32.mxu1 %v1496_v15 }
 0x1a9   :  { %v591_v19 = vpop.f32.mrf.mxu0 }
 0x1aa   :  { %v897_v21 = vadd.f32 %v896_v0, %v591_v19  ;;  %v1497_v22 = vadd.f32 %v1449_v17, %v1401_v18 }
 0x1ab   :  { %v593_v23 = vpop.f32.mrf.mxu0 }
 0x1ac   :  { %v1402_v26 = vmul.f32 %v1333_v20, %v897_v21  ;;  %2354 = vmatmul.mubr.f32.gmra.mxu1 %v1497_v22 }
 0x1ad   :  { %v596_v27 = vpop.f32.mrf.mxu0 }
 0x1ae   :  { %v902_v29 = vadd.f32 %v2254_v9, %v596_v27  ;;  %v1498_v30 = vadd.f32 %v1450_v25, %v1402_v26 }
 0x1af   :  { %v598_v31 = vpop.f32.mrf.mxu0 }
 0x1b0   :  { %v1403_v34 = vmul.f32 %v1338_v28, %v902_v29  ;;  %2356 = vmatprep.mubr.f32.mxu1 %v1498_v30 }
 0x1b1   :  { %v601_v35 = vpop.f32.mrf.mxu0 }
 0x1b2   :  { %v907_v37 = vadd.f32 %v906_v32, %v601_v35  ;;  %v1499_v38 = vadd.f32 %v1451_v33, %v1403_v34 }
 0x1b3   :  { %v603_v39 = vpop.f32.mrf.mxu0 }
 0x1b4   :  { %v1404_v42 = vmul.f32 %v1343_v36, %v907_v37  ;;  %2357 = vmatmul.mubr.f32.gmra.mxu1 %v1499_v38 }
 0x1b5   :  { %v606_v43 = vpop.f32.mrf.mxu0 }
 0x1b6   :  { %v912_v45 = vadd.f32 %v2257_v24, %v606_v43  ;;  %v1500_v46 = vadd.f32 %v1452_v41, %v1404_v42 }
 0x1b7   :  { %v608_v47 = vpop.f32.mrf.mxu0 }
 0x1b8   :  { %v1405_v50 = vmul.f32 %v1348_v44, %v912_v45  ;;  %2359 = vmatprep.mubr.f32.mxu1 %v1500_v46 }
 0x1b9   :  { %v611_v51 = vpop.f32.mrf.mxu0 }
 0x1ba   :  { %v917_v52 = vadd.f32 %v916_v48, %v611_v51  ;;  %v1501_v53 = vadd.f32 %v1453_v49, %v1405_v50 }
 0x1bb   :  { %v613_v55 = vpop.f32.mrf.mxu0 }
 0x1bc   :  { %v1406_v57 = vmul.f32 %v1353_v54, %v917_v52  ;;  %2360 = vmatmul.mubr.f32.gmra.mxu1 %v1501_v53 }
 0x1bd   :  { %v616_v58 = vpop.f32.mrf.mxu0 }
 0x1be   :  { %v922_v59 = vadd.f32 %v2260_v40, %v616_v58  ;;  %v1502_v60 = vadd.f32 %v1454_v56, %v1406_v57 }
 0x1bf   :  { %v618_v62 = vpop.f32.mrf.mxu0 }
 0x1c0   :  { %v1407_v1 = vmul.f32 %v1358_v61, %v922_v59  ;;  %2362 = vmatprep.mubr.f32.mxu1 %v1502_v60 }
 0x1c2   :  { %v1503_v2 = vadd.f32 %v1455_v63, %v1407_v1 }
 0x1c4   :  { %2363 = vmatmul.mubr.f32.gmra.mxu1 %v1503_v2 }
 0x1cc   :  { %v2295_v4 = vpop.f32.mrf.mxu1 }
 0x1cd   :  { %v1599_v5 = vadd.f32 %v2295_v4, %v3355_v3 }
 0x1ce   :  { %v1593_v6 = vpop.f32.mrf.mxu1 }
 0x1cf   :  { %vm1833_vm0 = vcmp.ge.f32.partialorder %v1599_v5, 0.0  ;;  %v1881_v7 = vmul.f32 0.01, %v1599_v5  ;;  %v1594_v8 = vadd.f32 %v3355_v3, %v1593_v6 }
 0x1d1   :  { %v1929_v9 = vsel %vm1833_vm0, %v1599_v5, %v1881_v7  ;;  %vm1832_vm1 = vcmp.ge.f32.partialorder %v1594_v8, 0.0  ;;  %v1880_v10 = vmul.f32 0.01, %v1594_v8 }
 0x1d2   :  { %1977 = vst [vmem:[%s3555_s6 + $0x8] sm:$0xff] %v1929_v9 }
 0x1d3   :  { %v1928_v11 = vsel %vm1832_vm1, %v1594_v8, %v1880_v10 }
 0x1d4   :  { %1976 = vst [vmem:[%s3555_s6] sm:$0xff] %v1928_v11  ;;  %v2298_v12 = vpop.f32.mrf.mxu1 }
 0x1d5   :  { %v1609_v13 = vadd.f32 %v2298_v12, %v3355_v3 }
 0x1d6   :  { %v1603_v14 = vpop.f32.mrf.mxu1 }
 0x1d7   :  { %vm1835_vm2 = vcmp.ge.f32.partialorder %v1609_v13, 0.0  ;;  %v1883_v15 = vmul.f32 0.01, %v1609_v13  ;;  %v1604_v16 = vadd.f32 %v3355_v3, %v1603_v14 }
 0x1d9   :  { %v1931_v0 = vsel %vm1835_vm2, %v1609_v13, %v1883_v15  ;;  %vm1834_vm3 = vcmp.ge.f32.partialorder %v1604_v16, 0.0  ;;  %v1882_v17 = vmul.f32 0.01, %v1604_v16 }
 0x1da   :  { %1979 = vst [vmem:[%s3555_s6 + $0x18] sm:$0xff] %v1931_v0 }
 0x1db   :  { %v1930_v18 = vsel %vm1834_vm3, %v1604_v16, %v1882_v17 }
 0x1dc   :  { %1978 = vst [vmem:[%s3555_s6 + $0x10] sm:$0xff] %v1930_v18  ;;  %v2301_v19 = vpop.f32.mrf.mxu1 }
 0x1dd   :  { %v1619_v20 = vadd.f32 %v2301_v19, %v3355_v3 }
 0x1de   :  { %v1613_v21 = vpop.f32.mrf.mxu1 }
 0x1df   :  { %vm1837_vm4 = vcmp.ge.f32.partialorder %v1619_v20, 0.0  ;;  %v1885_v22 = vmul.f32 0.01, %v1619_v20  ;;  %v1614_v23 = vadd.f32 %v3355_v3, %v1613_v21 }
 0x1e1   :  { %v1933_v24 = vsel %vm1837_vm4, %v1619_v20, %v1885_v22  ;;  %vm1836_vm5 = vcmp.ge.f32.partialorder %v1614_v23, 0.0  ;;  %v1884_v25 = vmul.f32 0.01, %v1614_v23 }
 0x1e2   :  { %1981 = vst [vmem:[%s3555_s6 + $0x28] sm:$0xff] %v1933_v24 }
 0x1e3   :  { %v1932_v26 = vsel %vm1836_vm5, %v1614_v23, %v1884_v25 }
 0x1e4   :  { %1980 = vst [vmem:[%s3555_s6 + $0x20] sm:$0xff] %v1932_v26  ;;  %v2304_v27 = vpop.f32.mrf.mxu1 }
 0x1e5   :  { %v1629_v28 = vadd.f32 %v2304_v27, %v3355_v3 }
 0x1e6   :  { %v1623_v29 = vpop.f32.mrf.mxu1 }
 0x1e7   :  { %vm1839_vm6 = vcmp.ge.f32.partialorder %v1629_v28, 0.0  ;;  %v1887_v30 = vmul.f32 0.01, %v1629_v28  ;;  %v1624_v31 = vadd.f32 %v3355_v3, %v1623_v29 }
 0x1e9   :  { %v1935_v32 = vsel %vm1839_vm6, %v1629_v28, %v1887_v30  ;;  %vm1838_vm7 = vcmp.ge.f32.partialorder %v1624_v31, 0.0  ;;  %v1886_v33 = vmul.f32 0.01, %v1624_v31 }
 0x1ea   :  { %1983 = vst [vmem:[%s3555_s6 + $0x38] sm:$0xff] %v1935_v32 }
 0x1eb   :  { %v1934_v34 = vsel %vm1838_vm7, %v1624_v31, %v1886_v33 }
 0x1ec   :  { %1982 = vst [vmem:[%s3555_s6 + $0x30] sm:$0xff] %v1934_v34  ;;  %v2307_v35 = vpop.f32.mrf.mxu1 }
 0x1ed   :  { %v1639_v36 = vadd.f32 %v2307_v35, %v3355_v3 }
 0x1ee   :  { %v1633_v37 = vpop.f32.mrf.mxu1 }
 0x1ef   :  { %vm1841_vm8 = vcmp.ge.f32.partialorder %v1639_v36, 0.0  ;;  %v1889_v38 = vmul.f32 0.01, %v1639_v36  ;;  %v1634_v39 = vadd.f32 %v3355_v3, %v1633_v37 }
 0x1f1   :  { %v1937_v40 = vsel %vm1841_vm8, %v1639_v36, %v1889_v38  ;;  %vm1840_vm9 = vcmp.ge.f32.partialorder %v1634_v39, 0.0  ;;  %v1888_v41 = vmul.f32 0.01, %v1634_v39 }
 0x1f2   :  { %1985 = vst [vmem:[%s3555_s6 + $0x48] sm:$0xff] %v1937_v40 }
 0x1f3   :  { %v1936_v42 = vsel %vm1840_vm9, %v1634_v39, %v1888_v41 }
 0x1f4   :  { %1984 = vst [vmem:[%s3555_s6 + $0x40] sm:$0xff] %v1936_v42  ;;  %v2310_v43 = vpop.f32.mrf.mxu1 }
 0x1f5   :  { %v1649_v44 = vadd.f32 %v2310_v43, %v3355_v3 }
 0x1f6   :  { %v1643_v45 = vpop.f32.mrf.mxu1 }
 0x1f7   :  { %vm1843_vm10 = vcmp.ge.f32.partialorder %v1649_v44, 0.0  ;;  %v1891_v46 = vmul.f32 0.01, %v1649_v44  ;;  %v1644_v47 = vadd.f32 %v3355_v3, %v1643_v45 }
 0x1f9   :  { %v1939_v48 = vsel %vm1843_vm10, %v1649_v44, %v1891_v46  ;;  %vm1842_vm11 = vcmp.ge.f32.partialorder %v1644_v47, 0.0  ;;  %v1890_v49 = vmul.f32 0.01, %v1644_v47 }
 0x1fa   :  { %1987 = vst [vmem:[%s3555_s6 + $0x58] sm:$0xff] %v1939_v48 }
 0x1fb   :  { %v1938_v50 = vsel %vm1842_vm11, %v1644_v47, %v1890_v49 }
 0x1fc   :  { %1986 = vst [vmem:[%s3555_s6 + $0x50] sm:$0xff] %v1938_v50  ;;  %v2313_v51 = vpop.f32.mrf.mxu1 }
 0x1fd   :  { %v1659_v52 = vadd.f32 %v2313_v51, %v3355_v3 }
 0x1fe   :  { %v1653_v53 = vpop.f32.mrf.mxu1 }
 0x1ff   :  { %vm1845_vm12 = vcmp.ge.f32.partialorder %v1659_v52, 0.0  ;;  %v1893_v54 = vmul.f32 0.01, %v1659_v52  ;;  %v1654_v55 = vadd.f32 %v3355_v3, %v1653_v53 }
 0x201   :  { %v1941_v56 = vsel %vm1845_vm12, %v1659_v52, %v1893_v54  ;;  %vm1844_vm13 = vcmp.ge.f32.partialorder %v1654_v55, 0.0  ;;  %v1892_v57 = vmul.f32 0.01, %v1654_v55 }
 0x202   :  { %1989 = vst [vmem:[%s3555_s6 + $0x68] sm:$0xff] %v1941_v56 }
 0x203   :  { %v1940_v58 = vsel %vm1844_vm13, %v1654_v55, %v1892_v57 }
 0x204   :  { %1988 = vst [vmem:[%s3555_s6 + $0x60] sm:$0xff] %v1940_v58  ;;  %v2316_v59 = vpop.f32.mrf.mxu1 }
 0x205   :  { %v1669_v60 = vadd.f32 %v2316_v59, %v3355_v3 }
 0x206   :  { %v1663_v61 = vpop.f32.mrf.mxu1 }
 0x207   :  { %vm1847_vm14 = vcmp.ge.f32.partialorder %v1669_v60, 0.0  ;;  %v1895_v62 = vmul.f32 0.01, %v1669_v60  ;;  %v1664_v63 = vadd.f32 %v3355_v3, %v1663_v61 }
 0x209   :  { %v1943_v1 = vsel %vm1847_vm14, %v1669_v60, %v1895_v62  ;;  %vm1846_vm15 = vcmp.ge.f32.partialorder %v1664_v63, 0.0  ;;  %v1894_v2 = vmul.f32 0.01, %v1664_v63 }
 0x20a   :  { %1991 = vst [vmem:[%s3555_s6 + $0x78] sm:$0xff] %v1943_v1 }
 0x20b   :  { %v1942_v4 = vsel %vm1846_vm15, %v1664_v63, %v1894_v2 }
 0x20c   :  { %1990 = vst [vmem:[%s3555_s6 + $0x70] sm:$0xff] %v1942_v4  ;;  %v2319_v5 = vpop.f32.mrf.mxu1 }
 0x20d   :  { %v1679_v6 = vadd.f32 %v2319_v5, %v3355_v3 }
 0x20e   :  { %v1673_v7 = vpop.f32.mrf.mxu1 }
 0x20f   :  { %vm1849_vm0 = vcmp.ge.f32.partialorder %v1679_v6, 0.0  ;;  %v1897_v8 = vmul.f32 0.01, %v1679_v6  ;;  %v1674_v9 = vadd.f32 %v3355_v3, %v1673_v7 }
 0x211   :  { %v1945_v10 = vsel %vm1849_vm0, %v1679_v6, %v1897_v8  ;;  %vm1848_vm1 = vcmp.ge.f32.partialorder %v1674_v9, 0.0  ;;  %v1896_v11 = vmul.f32 0.01, %v1674_v9 }
 0x212   :  { %1993 = vst [vmem:[%s3555_s6 + $0x88] sm:$0xff] %v1945_v10 }
 0x213   :  { %v1944_v12 = vsel %vm1848_vm1, %v1674_v9, %v1896_v11 }
 0x214   :  { %1992 = vst [vmem:[%s3555_s6 + $0x80] sm:$0xff] %v1944_v12  ;;  %v2322_v13 = vpop.f32.mrf.mxu1 }
 0x215   :  { %v1689_v14 = vadd.f32 %v2322_v13, %v3355_v3 }
 0x216   :  { %v1683_v15 = vpop.f32.mrf.mxu1 }
 0x217   :  { %vm1851_vm2 = vcmp.ge.f32.partialorder %v1689_v14, 0.0  ;;  %v1899_v16 = vmul.f32 0.01, %v1689_v14  ;;  %v1684_v0 = vadd.f32 %v3355_v3, %v1683_v15 }
 0x219   :  { %v1947_v17 = vsel %vm1851_vm2, %v1689_v14, %v1899_v16  ;;  %vm1850_vm3 = vcmp.ge.f32.partialorder %v1684_v0, 0.0  ;;  %v1898_v18 = vmul.f32 0.01, %v1684_v0 }
 0x21a   :  { %1995 = vst [vmem:[%s3555_s6 + $0x98] sm:$0xff] %v1947_v17 }
 0x21b   :  { %v1946_v19 = vsel %vm1850_vm3, %v1684_v0, %v1898_v18 }
 0x21c   :  { %1994 = vst [vmem:[%s3555_s6 + $0x90] sm:$0xff] %v1946_v19  ;;  %v2325_v20 = vpop.f32.mrf.mxu1 }
 0x21d   :  { %v1699_v21 = vadd.f32 %v2325_v20, %v3355_v3 }
 0x21e   :  { %v1693_v22 = vpop.f32.mrf.mxu1 }
 0x21f   :  { %vm1853_vm4 = vcmp.ge.f32.partialorder %v1699_v21, 0.0  ;;  %v1901_v23 = vmul.f32 0.01, %v1699_v21  ;;  %v1694_v24 = vadd.f32 %v3355_v3, %v1693_v22 }
 0x221   :  { %v1949_v25 = vsel %vm1853_vm4, %v1699_v21, %v1901_v23  ;;  %vm1852_vm5 = vcmp.ge.f32.partialorder %v1694_v24, 0.0  ;;  %v1900_v26 = vmul.f32 0.01, %v1694_v24 }
 0x222   :  { %1997 = vst [vmem:[%s3555_s6 + $0xa8] sm:$0xff] %v1949_v25 }
 0x223   :  { %v1948_v27 = vsel %vm1852_vm5, %v1694_v24, %v1900_v26 }
 0x224   :  { %1996 = vst [vmem:[%s3555_s6 + $0xa0] sm:$0xff] %v1948_v27  ;;  %v2328_v28 = vpop.f32.mrf.mxu1 }
 0x225   :  { %v1709_v29 = vadd.f32 %v2328_v28, %v3355_v3 }
 0x226   :  { %v1703_v30 = vpop.f32.mrf.mxu1 }
 0x227   :  { %vm1855_vm6 = vcmp.ge.f32.partialorder %v1709_v29, 0.0  ;;  %v1903_v31 = vmul.f32 0.01, %v1709_v29  ;;  %v1704_v32 = vadd.f32 %v3355_v3, %v1703_v30 }
 0x229   :  { %v1951_v33 = vsel %vm1855_vm6, %v1709_v29, %v1903_v31  ;;  %vm1854_vm7 = vcmp.ge.f32.partialorder %v1704_v32, 0.0  ;;  %v1902_v34 = vmul.f32 0.01, %v1704_v32 }
 0x22a   :  { %1999 = vst [vmem:[%s3555_s6 + $0xb8] sm:$0xff] %v1951_v33 }
 0x22b   :  { %v1950_v35 = vsel %vm1854_vm7, %v1704_v32, %v1902_v34 }
 0x22c   :  { %1998 = vst [vmem:[%s3555_s6 + $0xb0] sm:$0xff] %v1950_v35  ;;  %v2331_v36 = vpop.f32.mrf.mxu1 }
 0x22d   :  { %v1719_v37 = vadd.f32 %v2331_v36, %v3355_v3 }
 0x22e   :  { %v1713_v38 = vpop.f32.mrf.mxu1 }
 0x22f   :  { %vm1857_vm8 = vcmp.ge.f32.partialorder %v1719_v37, 0.0  ;;  %v1905_v39 = vmul.f32 0.01, %v1719_v37  ;;  %v1714_v40 = vadd.f32 %v3355_v3, %v1713_v38 }
 0x231   :  { %v1953_v41 = vsel %vm1857_vm8, %v1719_v37, %v1905_v39  ;;  %vm1856_vm9 = vcmp.ge.f32.partialorder %v1714_v40, 0.0  ;;  %v1904_v42 = vmul.f32 0.01, %v1714_v40 }
 0x232   :  { %2001 = vst [vmem:[%s3555_s6 + $0xc8] sm:$0xff] %v1953_v41 }
 0x233   :  { %v1952_v43 = vsel %vm1856_vm9, %v1714_v40, %v1904_v42 }
 0x234   :  { %2000 = vst [vmem:[%s3555_s6 + $0xc0] sm:$0xff] %v1952_v43  ;;  %v2334_v44 = vpop.f32.mrf.mxu1 }
 0x235   :  { %v1729_v45 = vadd.f32 %v2334_v44, %v3355_v3 }
 0x236   :  { %v1723_v46 = vpop.f32.mrf.mxu1 }
 0x237   :  { %vm1859_vm10 = vcmp.ge.f32.partialorder %v1729_v45, 0.0  ;;  %v1907_v47 = vmul.f32 0.01, %v1729_v45  ;;  %v1724_v48 = vadd.f32 %v3355_v3, %v1723_v46 }
 0x239   :  { %v1955_v49 = vsel %vm1859_vm10, %v1729_v45, %v1907_v47  ;;  %vm1858_vm11 = vcmp.ge.f32.partialorder %v1724_v48, 0.0  ;;  %v1906_v50 = vmul.f32 0.01, %v1724_v48 }
 0x23a   :  { %2003 = vst [vmem:[%s3555_s6 + $0xd8] sm:$0xff] %v1955_v49 }
 0x23b   :  { %v1954_v51 = vsel %vm1858_vm11, %v1724_v48, %v1906_v50 }
 0x23c   :  { %2002 = vst [vmem:[%s3555_s6 + $0xd0] sm:$0xff] %v1954_v51  ;;  %v2337_v52 = vpop.f32.mrf.mxu1 }
 0x23d   :  { %v1739_v53 = vadd.f32 %v2337_v52, %v3355_v3 }
 0x23e   :  { %v1733_v54 = vpop.f32.mrf.mxu1 }
 0x23f   :  { %vm1861_vm12 = vcmp.ge.f32.partialorder %v1739_v53, 0.0  ;;  %v1909_v55 = vmul.f32 0.01, %v1739_v53  ;;  %v1734_v56 = vadd.f32 %v3355_v3, %v1733_v54 }
 0x241   :  { %v1957_v57 = vsel %vm1861_vm12, %v1739_v53, %v1909_v55  ;;  %vm1860_vm13 = vcmp.ge.f32.partialorder %v1734_v56, 0.0  ;;  %v1908_v58 = vmul.f32 0.01, %v1734_v56 }
 0x242   :  { %2005 = vst [vmem:[%s3555_s6 + $0xe8] sm:$0xff] %v1957_v57 }
 0x243   :  { %v1956_v59 = vsel %vm1860_vm13, %v1734_v56, %v1908_v58 }
 0x244   :  { %2004 = vst [vmem:[%s3555_s6 + $0xe0] sm:$0xff] %v1956_v59  ;;  %v2340_v60 = vpop.f32.mrf.mxu1 }
 0x245   :  { %v1749_v61 = vadd.f32 %v2340_v60, %v3355_v3 }
 0x246   :  { %v1743_v62 = vpop.f32.mrf.mxu1 }
 0x247   :  { %vm1863_vm14 = vcmp.ge.f32.partialorder %v1749_v61, 0.0  ;;  %v1911_v63 = vmul.f32 0.01, %v1749_v61  ;;  %v1744_v1 = vadd.f32 %v3355_v3, %v1743_v62 }
 0x249   :  { %v1959_v2 = vsel %vm1863_vm14, %v1749_v61, %v1911_v63  ;;  %vm1862_vm15 = vcmp.ge.f32.partialorder %v1744_v1, 0.0  ;;  %v1910_v4 = vmul.f32 0.01, %v1744_v1 }
 0x24a   :  { %2007 = vst [vmem:[%s3555_s6 + $0xf8] sm:$0xff] %v1959_v2 }
 0x24b   :  { %v1958_v5 = vsel %vm1862_vm15, %v1744_v1, %v1910_v4 }
 0x24c   :  { %2006 = vst [vmem:[%s3555_s6 + $0xf0] sm:$0xff] %v1958_v5  ;;  %v2343_v6 = vpop.f32.mrf.mxu1 }
 0x24d   :  { %v1759_v7 = vadd.f32 %v2343_v6, %v3355_v3 }
 0x24e   :  { %v1753_v8 = vpop.f32.mrf.mxu1 }
 0x24f   :  { %vm1865_vm0 = vcmp.ge.f32.partialorder %v1759_v7, 0.0  ;;  %v1913_v9 = vmul.f32 0.01, %v1759_v7  ;;  %v1754_v10 = vadd.f32 %v3355_v3, %v1753_v8 }
 0x251   :  { %v1961_v11 = vsel %vm1865_vm0, %v1759_v7, %v1913_v9  ;;  %vm1864_vm1 = vcmp.ge.f32.partialorder %v1754_v10, 0.0  ;;  %v1912_v12 = vmul.f32 0.01, %v1754_v10 }
 0x252   :  { %2009 = vst [vmem:[%s3555_s6 + $0x108] sm:$0xff] %v1961_v11 }
 0x253   :  { %v1960_v13 = vsel %vm1864_vm1, %v1754_v10, %v1912_v12 }
 0x254   :  { %2008 = vst [vmem:[%s3555_s6 + $0x100] sm:$0xff] %v1960_v13  ;;  %v2346_v14 = vpop.f32.mrf.mxu1 }
 0x255   :  { %v1769_v15 = vadd.f32 %v2346_v14, %v3355_v3 }
 0x256   :  { %v1763_v16 = vpop.f32.mrf.mxu1 }
 0x257   :  { %vm1867_vm2 = vcmp.ge.f32.partialorder %v1769_v15, 0.0  ;;  %v1915_v0 = vmul.f32 0.01, %v1769_v15  ;;  %v1764_v17 = vadd.f32 %v3355_v3, %v1763_v16 }
 0x259   :  { %v1963_v18 = vsel %vm1867_vm2, %v1769_v15, %v1915_v0  ;;  %vm1866_vm3 = vcmp.ge.f32.partialorder %v1764_v17, 0.0  ;;  %v1914_v19 = vmul.f32 0.01, %v1764_v17 }
 0x25a   :  { %2011 = vst [vmem:[%s3555_s6 + $0x118] sm:$0xff] %v1963_v18 }
 0x25b   :  { %v1962_v20 = vsel %vm1866_vm3, %v1764_v17, %v1914_v19 }
 0x25c   :  { %2010 = vst [vmem:[%s3555_s6 + $0x110] sm:$0xff] %v1962_v20  ;;  %v2349_v21 = vpop.f32.mrf.mxu1 }
 0x25d   :  { %v1779_v22 = vadd.f32 %v2349_v21, %v3355_v3 }
 0x25e   :  { %v1773_v23 = vpop.f32.mrf.mxu1 }
 0x25f   :  { %vm1869_vm4 = vcmp.ge.f32.partialorder %v1779_v22, 0.0  ;;  %v1917_v24 = vmul.f32 0.01, %v1779_v22  ;;  %v1774_v25 = vadd.f32 %v3355_v3, %v1773_v23 }
 0x261   :  { %v1965_v26 = vsel %vm1869_vm4, %v1779_v22, %v1917_v24  ;;  %vm1868_vm5 = vcmp.ge.f32.partialorder %v1774_v25, 0.0  ;;  %v1916_v27 = vmul.f32 0.01, %v1774_v25 }
 0x262   :  { %2013 = vst [vmem:[%s3555_s6 + $0x128] sm:$0xff] %v1965_v26 }
 0x263   :  { %v1964_v28 = vsel %vm1868_vm5, %v1774_v25, %v1916_v27 }
 0x264   :  { %2012 = vst [vmem:[%s3555_s6 + $0x120] sm:$0xff] %v1964_v28  ;;  %v2352_v29 = vpop.f32.mrf.mxu1 }
 0x265   :  { %v1789_v30 = vadd.f32 %v2352_v29, %v3355_v3 }
 0x266   :  { %v1783_v31 = vpop.f32.mrf.mxu1 }
 0x267   :  { %vm1871_vm6 = vcmp.ge.f32.partialorder %v1789_v30, 0.0  ;;  %v1919_v32 = vmul.f32 0.01, %v1789_v30  ;;  %v1784_v33 = vadd.f32 %v3355_v3, %v1783_v31 }
 0x269   :  { %v1967_v34 = vsel %vm1871_vm6, %v1789_v30, %v1919_v32  ;;  %vm1870_vm7 = vcmp.ge.f32.partialorder %v1784_v33, 0.0  ;;  %v1918_v35 = vmul.f32 0.01, %v1784_v33 }
 0x26a   :  { %2015 = vst [vmem:[%s3555_s6 + $0x138] sm:$0xff] %v1967_v34 }
 0x26b   :  { %v1966_v36 = vsel %vm1870_vm7, %v1784_v33, %v1918_v35 }
 0x26c   :  { %2014 = vst [vmem:[%s3555_s6 + $0x130] sm:$0xff] %v1966_v36  ;;  %v2355_v37 = vpop.f32.mrf.mxu1 }
 0x26d   :  { %v1799_v38 = vadd.f32 %v2355_v37, %v3355_v3 }
 0x26e   :  { %v1793_v39 = vpop.f32.mrf.mxu1 }
 0x26f   :  { %vm1873_vm8 = vcmp.ge.f32.partialorder %v1799_v38, 0.0  ;;  %v1921_v40 = vmul.f32 0.01, %v1799_v38  ;;  %v1794_v41 = vadd.f32 %v3355_v3, %v1793_v39 }
 0x271   :  { %v1969_v42 = vsel %vm1873_vm8, %v1799_v38, %v1921_v40  ;;  %vm1872_vm9 = vcmp.ge.f32.partialorder %v1794_v41, 0.0  ;;  %v1920_v43 = vmul.f32 0.01, %v1794_v41 }
 0x272   :  { %2017 = vst [vmem:[%s3555_s6 + $0x148] sm:$0xff] %v1969_v42 }
 0x273   :  { %v1968_v44 = vsel %vm1872_vm9, %v1794_v41, %v1920_v43 }
 0x274   :  { %2016 = vst [vmem:[%s3555_s6 + $0x140] sm:$0xff] %v1968_v44  ;;  %v2358_v45 = vpop.f32.mrf.mxu1 }
 0x275   :  { %v1809_v46 = vadd.f32 %v2358_v45, %v3355_v3 }
 0x276   :  { %v1803_v47 = vpop.f32.mrf.mxu1 }
 0x277   :  { %vm1875_vm10 = vcmp.ge.f32.partialorder %v1809_v46, 0.0  ;;  %v1923_v48 = vmul.f32 0.01, %v1809_v46  ;;  %v1804_v49 = vadd.f32 %v3355_v3, %v1803_v47 }
 0x279   :  { %v1971_v50 = vsel %vm1875_vm10, %v1809_v46, %v1923_v48  ;;  %vm1874_vm11 = vcmp.ge.f32.partialorder %v1804_v49, 0.0  ;;  %v1922_v51 = vmul.f32 0.01, %v1804_v49 }
 0x27a   :  { %2019 = vst [vmem:[%s3555_s6 + $0x158] sm:$0xff] %v1971_v50 }
 0x27b   :  { %v1970_v52 = vsel %vm1874_vm11, %v1804_v49, %v1922_v51 }
 0x27c   :  { %2018 = vst [vmem:[%s3555_s6 + $0x150] sm:$0xff] %v1970_v52  ;;  %v2361_v53 = vpop.f32.mrf.mxu1 }
 0x27d   :  { %v1819_v54 = vadd.f32 %v2361_v53, %v3355_v3 }
 0x27e   :  { %v1813_v55 = vpop.f32.mrf.mxu1 }
 0x27f   :  { %vm1877_vm12 = vcmp.ge.f32.partialorder %v1819_v54, 0.0  ;;  %v1925_v56 = vmul.f32 0.01, %v1819_v54  ;;  %v1814_v57 = vadd.f32 %v3355_v3, %v1813_v55 }
 0x281   :  { %v1973_v58 = vsel %vm1877_vm12, %v1819_v54, %v1925_v56  ;;  %vm1876_vm13 = vcmp.ge.f32.partialorder %v1814_v57, 0.0  ;;  %v1924_v59 = vmul.f32 0.01, %v1814_v57 }
 0x282   :  { %2021 = vst [vmem:[%s3555_s6 + $0x168] sm:$0xff] %v1973_v58 }
 0x283   :  { %v1972_v60 = vsel %vm1876_vm13, %v1814_v57, %v1924_v59 }
 0x284   :  { %2020 = vst [vmem:[%s3555_s6 + $0x160] sm:$0xff] %v1972_v60  ;;  %v2364_v61 = vpop.f32.mrf.mxu1 }
 0x285   :  { %v1829_v62 = vadd.f32 %v2364_v61, %v3355_v3 }
 0x286   :  { %v1823_v63 = vpop.f32.mrf.mxu1 }
 0x287   :  { %vm1879_vm14 = vcmp.ge.f32.partialorder %v1829_v62, 0.0  ;;  %v1927_v1 = vmul.f32 0.01, %v1829_v62  ;;  %v1824_v2 = vadd.f32 %v3355_v3, %v1823_v63 }
 0x289   :  { %v1975_v4 = vsel %vm1879_vm14, %v1829_v62, %v1927_v1  ;;  %vm1878_vm15 = vcmp.ge.f32.partialorder %v1824_v2, 0.0  ;;  %v1926_v5 = vmul.f32 0.01, %v1824_v2 }
 0x28a   :  { %2023 = vst [vmem:[%s3555_s6 + $0x178] sm:$0xff] %v1975_v4 }
 0x28b   :  { %v1974_v6 = vsel %vm1878_vm15, %v1824_v2, %v1926_v5 }
 0x28c   :  { %2022 = vst [vmem:[%s3555_s6 + $0x170] sm:$0xff] %v1974_v6 }

</bundles_post_ra>
